<compile_context>
chip_gen: v7x
topology: tpu7x:2x2x1
jax: 0.10.0
libtpu: 0.0.40
codegen_flags: <defaults>
</compile_context>

<pallas_src>
import math

import numpy as np

import jax
import jax.numpy as jnp
from jax.experimental import pallas as pl
from jax.experimental.pallas import tpu as pltpu


# ----------------------- constant structure matrices ------------------------

def _row_select(n_img, h_out, h_in, ki, stride, pad, clamp=False):
    """(n*h_out, n*h_in) 0/1 matrix selecting input row stride*ho+ki-pad."""
    m = np.zeros((n_img * h_out, n_img * h_in), np.float32)
    for b in range(n_img):
        for ho in range(h_out):
            hi = stride * ho + ki - pad
            if clamp:
                hi = min(max(hi, 0), h_in - 1)
            if 0 <= hi < h_in:
                m[b * h_out + ho, b * h_in + hi] = 1.0
    return m


def _col_place(w_in, w_out, kj, stride, pad, clamp=False):
    """(w_in, w_out) 0/1 placement matrix: input col stride*wo+kj-pad -> wo."""
    p = np.zeros((w_in, w_out), np.float32)
    for wo in range(w_out):
        wi = stride * wo + kj - pad
        if clamp:
            wi = min(max(wi, 0), w_in - 1)
        if 0 <= wi < w_in:
            p[wi, wo] = 1.0
    return p


def _bn_fold(gamma, beta, mean, var, eps=1e-5):
    gamma, beta, mean, var = (np.asarray(t, np.float32)
                              for t in (gamma, beta, mean, var))
    scale = gamma / np.sqrt(var + eps)
    shift = beta - mean * scale
    return scale, shift


def _conv3x3_bcat(w_hwio, scale, shift, w_in, w_out, stride):
    """3x3 conv (pad=1) + folded BN: concatenated weight B_cat and shift.

    out = concat([X_tap0, X_tap1, X_tap2], lanes) @ B_cat + sh,
    B_cat shape (3*w_in*cin, w_out*cout).  W taps / channel mix / BN scale
    live in B_cat; the H taps are produced by the caller (roll or L_cat)."""
    w_np = np.asarray(w_hwio, np.float32)
    _, _, cin, cout = w_np.shape
    wsc = w_np * np.asarray(scale, np.float32)[None, None, None, :]
    blocks = []
    for ki in range(3):
        b = np.zeros((w_in * cin, w_out * cout), np.float32)
        for kj in range(3):
            b += np.kron(_col_place(w_in, w_out, kj, stride, 1), wsc[ki, kj])
        blocks.append(b)
    B_cat = np.concatenate(blocks, axis=0)
    sh = np.tile(np.asarray(shift, np.float32), w_out)[None, :]
    return B_cat, sh


def _maxpool_cats(n_img, h_in, w_in, c):
    """MaxPool2d(3, stride=2, pad=1) as one lane-gather and one row-gather
    matmul (3 taps concatenated); clamped taps duplicate an in-window element,
    so the result equals the -inf-padded PyTorch maxpool for (k=3,s=2,p=1)."""
    h_out = (h_in + 2 - 3) // 2 + 1
    w_out = (w_in + 2 - 3) // 2 + 1
    PR = [_row_select(n_img, h_out, h_in, ki, 2, 1, clamp=True) for ki in range(3)]
    PS = [np.kron(_col_place(w_in, w_out, kj, 2, 1, clamp=True),
                  np.eye(c, dtype=np.float32)) for kj in range(3)]
    return np.concatenate(PR, axis=0), np.concatenate(PS, axis=1)


def _pack_rows(pieces, dtype, lane_width, row_align):
    """Pack named 2D arrays row-wise into one slab; return slab + offsets."""
    offs, bufs, r = {}, [], 0
    for name, a in pieces:
        a = np.asarray(a, np.float32)
        hh, ww = a.shape
        assert ww <= lane_width, (name, ww, lane_width)
        hp = -(-hh // row_align) * row_align
        buf = np.zeros((hp, lane_width), np.float32)
        buf[:hh, :ww] = a
        offs[name] = (r, hh, ww)
        bufs.append(buf)
        r += hp
    slab = jnp.asarray(np.concatenate(bufs, axis=0), dtype)
    return slab, offs


# ------------------------------- parameters ---------------------------------

def init_params(key, scaling=0.125, num_classes=10):
    c1 = int(64 * scaling)     # 8
    c2 = int(128 * scaling)    # 16
    ks = jax.random.split(key, 8)

    def kaiming(k, kh, kw, cin, cout):
        # kaiming_normal_, mode='fan_out', nonlinearity='relu'
        std = math.sqrt(2.0 / (cout * kh * kw))
        return std * jax.random.normal(k, (kh, kw, cin, cout), jnp.float32)

    def bn_params(c):
        return (jnp.ones((c,), jnp.float32), jnp.zeros((c,), jnp.float32),
                jnp.zeros((c,), jnp.float32), jnp.ones((c,), jnp.float32))

    bound = 1.0 / math.sqrt(c2)
    return {
        "conv1_w": kaiming(ks[0], 3, 3, 3, c1),
        "bn1": bn_params(c1),
        "block1": {   # BasicBlock(c1 -> c1, stride 1)
            "conv1_w": kaiming(ks[1], 3, 3, c1, c1), "bn1": bn_params(c1),
            "conv2_w": kaiming(ks[2], 3, 3, c1, c1), "bn2": bn_params(c1),
        },
        "block2": {   # BasicBlock(c1 -> c2, stride 2, 1x1 downsample)
            "conv1_w": kaiming(ks[3], 3, 3, c1, c2), "bn1": bn_params(c2),
            "conv2_w": kaiming(ks[4], 3, 3, c2, c2), "bn2": bn_params(c2),
            "ds_w": kaiming(ks[5], 1, 1, c1, c2).reshape(c1, c2),
            "bn_ds": bn_params(c2),
        },
        "fc_w": jax.random.uniform(ks[6], (c2, num_classes), jnp.float32,
                                   minval=-bound, maxval=bound),
        "fc_b": jax.random.uniform(ks[7], (num_classes,), jnp.float32,
                                   minval=-bound, maxval=bound),
    }


def build_plan(params, n_img=2, h=16, w=16):
    """Fold BN, build all constant matrices and pack them into two slabs."""
    c_in = int(params["conv1_w"].shape[-2])
    c1 = int(params["conv1_w"].shape[-1])
    c2 = int(params["block2"]["conv2_w"].shape[-1])
    ncls = int(params["fc_w"].shape[1])
    hp, wp = (h + 2 - 3) // 2 + 1, (w + 2 - 3) // 2 + 1     # after maxpool
    h2, w2 = (hp + 2 - 3) // 2 + 1, (wp + 2 - 3) // 2 + 1   # after stride-2 conv

    big, small = [], []

    # stem conv + bn1
    s, b = _bn_fold(*params["bn1"])
    B, sh = _conv3x3_bcat(params["conv1_w"], s, b, w, w, 1)
    big.append(("B_stem", B)); small.append(("sh_stem", sh))

    # maxpool
    PR_cat, PS_cat = _maxpool_cats(n_img, h, w, c1)
    big += [("PS_cat", PS_cat), ("PR_cat", PR_cat)]

    # block 1 (stride 1)
    blk = params["block1"]
    s1, b1 = _bn_fold(*blk["bn1"]); s2, b2 = _bn_fold(*blk["bn2"])
    B, sh = _conv3x3_bcat(blk["conv1_w"], s1, b1, wp, wp, 1)
    big.append(("B_b1c1", B)); small.append(("sh_b1c1", sh))
    B, sh = _conv3x3_bcat(blk["conv2_w"], s2, b2, wp, wp, 1)
    big.append(("B_b1c2", B)); small.append(("sh_b1c2", sh))

    # block 2 (stride 2 + 1x1 downsample)
    blk = params["block2"]
    s1, b1 = _bn_fold(*blk["bn1"]); s2, b2 = _bn_fold(*blk["bn2"])
    sd, bd = _bn_fold(*blk["bn_ds"])
    L_cat = np.concatenate(
        [_row_select(n_img, h2, hp, ki, 2, 1) for ki in range(3)], axis=0)
    big.append(("L_b2c1", L_cat))
    B, sh = _conv3x3_bcat(blk["conv1_w"], s1, b1, wp, w2, 2)
    big.append(("B_b2c1", B)); small.append(("sh_b2c1", sh))
    D_ds = np.kron(_col_place(wp, w2, 0, 2, 0),
                   np.asarray(blk["ds_w"], np.float32) * sd[None, :])
    big.append(("D_ds", D_ds)); small.append(("sh_ds", np.tile(bd, w2)[None, :]))
    B, sh = _conv3x3_bcat(blk["conv2_w"], s2, b2, w2, w2, 1)
    big.append(("B_b2c2", B)); small.append(("sh_b2c2", sh))

    # global avg pool + fc  (W reduction folded into the fc weight: W2 = A_w @ fc_w)
    A_h = np.kron(np.eye(n_img, dtype=np.float32),
                  np.ones((1, h2), np.float32)) / float(h2 * w2)
    A_w = np.kron(np.ones((w2, 1), np.float32), np.eye(c2, dtype=np.float32))
    W2 = A_w @ np.asarray(params["fc_w"], np.float32)
    big += [("A_h", A_h), ("W2", W2)]
    small.append(("fc_b", np.asarray(params["fc_b"], np.float32)[None, :]))

    bw = -(-max(a.shape[1] for _, a in big) // 128) * 128
    sw = -(-max(a.shape[1] for _, a in small) // 128) * 128
    slab_b, offs_b = _pack_rows(big, jnp.bfloat16, bw, 16)   # bf16 tile: (16,128)
    slab_s, offs_s = _pack_rows(small, jnp.float32, sw, 8)   # f32  tile: (8,128)

    meta = dict(n=n_img, c_in=c_in, h=h, w=w, hp=hp, wp=wp, h2=h2, w2=w2,
                c1=c1, c2=c2, ncls=ncls)
    return dict(slab_b=slab_b, slab_s=slab_s, offs_b=offs_b, offs_s=offs_s,
                meta=meta)


# ------------------------------ fused kernel --------------------------------

def make_forward(plan):
    offs_b, offs_s, meta = plan["offs_b"], plan["offs_s"], plan["meta"]
    n, c_in, h, w = meta["n"], meta["c_in"], meta["h"], meta["w"]
    hp, wp, h2, w2 = meta["hp"], meta["wp"], meta["h2"], meta["w2"]
    c1, c2, ncls = meta["c1"], meta["c2"], meta["ncls"]

    def kernel(x_ref, bslab_ref, sslab_ref, out_ref):
        def B(name):                               # static slice of bf16 slab
            r0, hh, ww = offs_b[name]
            return bslab_ref[r0:r0 + hh, 0:ww]

        def S(name):                               # static slice of f32 slab
            r0, hh, ww = offs_s[name]
            return sslab_ref[r0:r0 + hh, 0:ww]

        def mm(a, b):
            return jnp.dot(a, b, preferred_element_type=jnp.float32)

        bf16 = jnp.bfloat16

        def conv3x3_s1(x, h_img, bname, shname, residual=None):
            # 3x3 stride-1 pad-1 conv + folded eval-BN as ONE MXU contraction:
            # H taps via pltpu.roll (jnp.roll convention) + iota boundary mask,
            # lane-concatenated and multiplied by the concatenated B matrix.
            rows = x.shape[0]
            r = jax.lax.broadcasted_iota(jnp.int32, (rows, 1), 0) % h_img
            tap0 = jnp.where(r != 0, pltpu.roll(x, 1, 0), 0.0)            # hi=ho-1
            tap2 = jnp.where(r != h_img - 1,
                             pltpu.roll(x, rows - 1, 0), 0.0)             # hi=ho+1
            t = jnp.concatenate([tap0, x, tap2], axis=-1).astype(bf16)
            o = mm(t, B(bname)) + S(shname)
            if residual is not None:
                o = o + residual
            return jnp.maximum(o, 0.0)

        x0 = x_ref[...]                                   # (n*h, w*c_in) f32

        # --- stem: conv3x3(s1) -> BN -> ReLU ---
        s = conv3x3_s1(x0, h, "B_stem", "sh_stem")        # (n*h, w*c1)

        # --- maxpool 3x3 / s2 / p1 (separable max; clamped taps == -inf pad) ---
        wc = wp * c1
        sc = mm(s.astype(bf16), B("PS_cat"))              # (n*h, 3*wp*c1)
        mw = jnp.maximum(jnp.maximum(sc[:, 0:wc], sc[:, wc:2 * wc]),
                         sc[:, 2 * wc:3 * wc])            # (n*h, wp*c1)
        nh = n * hp
        pr = mm(B("PR_cat"), mw.astype(bf16))             # (3*n*hp, wp*c1)
        x1 = jnp.maximum(jnp.maximum(pr[0:nh], pr[nh:2 * nh]),
                         pr[2 * nh:3 * nh])               # (n*hp, wp*c1)

        # --- block 1: BasicBlock(c1 -> c1, stride 1), identity residual ---
        o = conv3x3_s1(x1, hp, "B_b1c1", "sh_b1c1")
        x2 = conv3x3_s1(o, hp, "B_b1c2", "sh_b1c2", residual=x1)

        # --- block 2 conv1 (stride 2): one row-gather matmul + one contraction ---
        lx = mm(B("L_b2c1"), x2.astype(bf16))             # (3*n*h2, wp*c1)
        nh2 = n * h2
        t = jnp.concatenate([lx[0:nh2], lx[nh2:2 * nh2], lx[2 * nh2:3 * nh2]],
                            axis=-1).astype(bf16)         # (n*h2, 3*wp*c1)
        o = jnp.maximum(mm(t, B("B_b2c1")) + S("sh_b2c1"), 0.0)

        # --- downsample 1x1(s2)+BN: stride-2 row pick == middle L tap (reuse) ---
        idn = mm(lx[nh2:2 * nh2].astype(bf16), B("D_ds")) + S("sh_ds")

        # --- block 2 conv2 + residual + ReLU ---
        x3 = conv3x3_s1(o, h2, "B_b2c2", "sh_b2c2", residual=idn)  # (n*h2, w2*c2)

        # --- global average pool + fc (avg over W folded into W2) ---
        pooled = mm(B("A_h"), x3.astype(bf16))            # (n, w2*c2)
        out_ref[...] = (mm(pooled.astype(bf16), B("W2")) + S("fc_b")
                        ).astype(out_ref.dtype)

    @jax.jit
    def forward(slab_b, slab_s, x_nchw):
        if x_nchw.shape != (n, c_in, h, w):
            raise ValueError(
                f"plan was built for input shape {(n, c_in, h, w)}, "
                f"got {x_nchw.shape}")
        # single entry transpose: NCHW -> lane-dense 2D (N*H, W*C)
        x2d = jnp.transpose(x_nchw, (0, 2, 3, 1)).reshape(n * h, w * c_in)
        x2d = x2d.astype(jnp.float32)
        vmem = pl.BlockSpec(memory_space=pltpu.MemorySpace.VMEM)
        return pl.pallas_call(
            kernel,
            out_shape=jax.ShapeDtypeStruct((n, ncls), jnp.float32),
            in_specs=[vmem, vmem, vmem],
            out_specs=vmem,
        )(x2d, slab_b, slab_s)

    return forward


# --------------------------------- main --------------------------------------

if __name__ == "__main__":
    key = jax.random.PRNGKey(0)
    k_param, k_x = jax.random.split(key)
    params = init_params(k_param, scaling=0.125, num_classes=10)
    x = jax.random.normal(k_x, (2, 3, 16, 16), jnp.float32)     # NCHW like PyTorch

    plan = build_plan(params, n_img=2, h=16, w=16)
    fwd = make_forward(plan)

    logits = fwd(plan["slab_b"], plan["slab_s"], x)
    jax.block_until_ready(logits)
    assert logits.shape == (2, 10) and logits.dtype == jnp.float32
    print("KERNEL_OK")
</pallas_src>

<mosaic_0001>
module attributes {stable_mosaic.version = 11 : i64} {
  func.func @kernel(%arg0: memref<32x48xf32, #tpu.memory_space<vmem>>, %arg1: memref<1264x256xbf16, #tpu.memory_space<vmem>>, %arg2: memref<56x128xf32, #tpu.memory_space<vmem>>, %arg3: memref<2x10xf32, #tpu.memory_space<vmem>>) attributes {dimension_semantics = [], scalar_prefetch = 0 : i64, scratch_operands = 0 : i64, tpu.core_type = #tpu.core_type<tc>} {
    %c0 = arith.constant 0 : index
    %c0_0 = arith.constant 0 : index
    %0 = vector.load %arg0[%c0, %c0_0] : memref<32x48xf32, #tpu.memory_space<vmem>>, vector<32x48xf32>
    %1 = tpu.iota {dimensions = array<i32: 0>} : vector<32x1xi32>
    %c16_i32 = arith.constant 16 : i32
    %c0_i32 = arith.constant 0 : i32
    %2 = arith.cmpi eq, %c16_i32, %c0_i32 : i32
    %c1_i32 = arith.constant 1 : i32
    %3 = arith.select %2, %c1_i32, %c16_i32 : i32
    %4 = vector.broadcast %3 : i32 to vector<32x1xi32>
    %5 = arith.remsi %1, %4 : vector<32x1xi32>
    %c0_i32_1 = arith.constant 0 : i32
    %6 = vector.broadcast %c0_i32_1 : i32 to vector<32x1xi32>
    %7 = arith.cmpi ne, %5, %6 : vector<32x1xi32>
    %c0_i32_2 = arith.constant 0 : i32
    %8 = vector.broadcast %c0_i32_2 : i32 to vector<32x1xi32>
    %9 = arith.cmpi slt, %5, %8 : vector<32x1xi32>
    %c0_i32_3 = arith.constant 0 : i32
    %10 = arith.cmpi slt, %3, %c0_i32_3 : i32
    %11 = vector.broadcast %10 : i1 to vector<32x1xi1>
    %12 = vector.broadcast %11 : vector<32x1xi1> to vector<32x1xi1>
    %13 = arith.xori %9, %12 : vector<32x1xi1>
    %14 = arith.andi %13, %7 : vector<32x1xi1>
    %15 = vector.broadcast %3 : i32 to vector<32x1xi32>
    %16 = arith.addi %5, %15 : vector<32x1xi32>
    %17 = arith.select %14, %16, %5 : vector<32x1xi1>, vector<32x1xi32>
    %c0_i32_4 = arith.constant 0 : i32
    %18 = vector.broadcast %c0_i32_4 : i32 to vector<32x1xi32>
    %19 = arith.cmpi ne, %17, %18 : vector<32x1xi32>
    %c1_i32_5 = arith.constant 1 : i32
    %20 = tpu.dynamic_rotate %0 by %c1_i32_5 dim 0 : vector<32x48xf32>, i32 -> vector<32x48xf32>
    %cst = arith.constant 0.000000e+00 : f32
    %21 = vector.shape_cast %19 : vector<32x1xi1> to vector<32x1xi1>
    %22 = vector.broadcast %21 : vector<32x1xi1> to vector<32x48xi1>
    %23 = vector.broadcast %cst : f32 to vector<32x48xf32>
    %24 = arith.select %22, %20, %23 : vector<32x48xi1>, vector<32x48xf32>
    %c15_i32 = arith.constant 15 : i32
    %25 = vector.broadcast %c15_i32 : i32 to vector<32x1xi32>
    %26 = arith.cmpi ne, %17, %25 : vector<32x1xi32>
    %c31_i32 = arith.constant 31 : i32
    %27 = tpu.dynamic_rotate %0 by %c31_i32 dim 0 : vector<32x48xf32>, i32 -> vector<32x48xf32>
    %cst_6 = arith.constant 0.000000e+00 : f32
    %28 = vector.shape_cast %26 : vector<32x1xi1> to vector<32x1xi1>
    %29 = vector.broadcast %28 : vector<32x1xi1> to vector<32x48xi1>
    %30 = vector.broadcast %cst_6 : f32 to vector<32x48xf32>
    %31 = arith.select %29, %27, %30 : vector<32x48xi1>, vector<32x48xf32>
    %32 = tpu.concatenate %24, %0, %31 in 1 : vector<32x48xf32>, vector<32x48xf32>, vector<32x48xf32> -> vector<32x144xf32>
    %33 = arith.truncf %32 : vector<32x144xf32> to vector<32x144xbf16>
    %c0_7 = arith.constant 0 : index
    %c0_8 = arith.constant 0 : index
    %34 = vector.load %arg1[%c0_7, %c0_8] : memref<1264x256xbf16, #tpu.memory_space<vmem>>, vector<144x128xbf16>
    %cst_9 = arith.constant dense<0.000000e+00> : vector<32x128xf32>
    %35 = tpu.matmul %33, %34, %cst_9 {dimension_numbers = #tpu.dot_dimension_numbers<[1], [0], [0], [1], [0, 0, 1, 1], [], []>} : vector<32x144xbf16>, vector<144x128xbf16>, vector<32x128xf32> -> vector<32x128xf32>
    %c0_10 = arith.constant 0 : index
    %c0_11 = arith.constant 0 : index
    %36 = vector.load %arg2[%c0_10, %c0_11] : memref<56x128xf32, #tpu.memory_space<vmem>>, vector<1x128xf32>
    %37 = vector.broadcast %36 : vector<1x128xf32> to vector<32x128xf32>
    %38 = arith.addf %35, %37 : vector<32x128xf32>
    %cst_12 = arith.constant 0.000000e+00 : f32
    %39 = vector.broadcast %cst_12 : f32 to vector<32x128xf32>
    %40 = arith.maximumf %38, %39 : vector<32x128xf32>
    %41 = arith.truncf %40 : vector<32x128xf32> to vector<32x128xbf16>
    %c144 = arith.constant 144 : index
    %c0_13 = arith.constant 0 : index
    %42 = vector.load %arg1[%c144, %c0_13] : memref<1264x256xbf16, #tpu.memory_space<vmem>>, vector<128x192xbf16>
    %cst_14 = arith.constant dense<0.000000e+00> : vector<32x192xf32>
    %43 = tpu.matmul %41, %42, %cst_14 {dimension_numbers = #tpu.dot_dimension_numbers<[1], [0], [0], [1], [0, 0, 1, 1], [], []>} : vector<32x128xbf16>, vector<128x192xbf16>, vector<32x192xf32> -> vector<32x192xf32>
    %44 = vector.extract_strided_slice %43 {offsets = [0, 0], sizes = [32, 64], strides = [1, 1]} : vector<32x192xf32> to vector<32x64xf32>
    %45 = vector.extract_strided_slice %43 {offsets = [0, 64], sizes = [32, 64], strides = [1, 1]} : vector<32x192xf32> to vector<32x64xf32>
    %46 = arith.maximumf %44, %45 : vector<32x64xf32>
    %47 = vector.extract_strided_slice %43 {offsets = [0, 128], sizes = [32, 64], strides = [1, 1]} : vector<32x192xf32> to vector<32x64xf32>
    %48 = arith.maximumf %46, %47 : vector<32x64xf32>
    %c272 = arith.constant 272 : index
    %c0_15 = arith.constant 0 : index
    %49 = vector.load %arg1[%c272, %c0_15] : memref<1264x256xbf16, #tpu.memory_space<vmem>>, vector<48x32xbf16>
    %50 = arith.truncf %48 : vector<32x64xf32> to vector<32x64xbf16>
    %cst_16 = arith.constant dense<0.000000e+00> : vector<48x64xf32>
    %51 = tpu.matmul %49, %50, %cst_16 {dimension_numbers = #tpu.dot_dimension_numbers<[1], [0], [0], [1], [0, 0, 1, 1], [], []>} : vector<48x32xbf16>, vector<32x64xbf16>, vector<48x64xf32> -> vector<48x64xf32>
    %52 = vector.extract_strided_slice %51 {offsets = [0, 0], sizes = [16, 64], strides = [1, 1]} : vector<48x64xf32> to vector<16x64xf32>
    %53 = vector.extract_strided_slice %51 {offsets = [16, 0], sizes = [16, 64], strides = [1, 1]} : vector<48x64xf32> to vector<16x64xf32>
    %54 = arith.maximumf %52, %53 : vector<16x64xf32>
    %55 = vector.extract_strided_slice %51 {offsets = [32, 0], sizes = [16, 64], strides = [1, 1]} : vector<48x64xf32> to vector<16x64xf32>
    %56 = arith.maximumf %54, %55 : vector<16x64xf32>
    %57 = tpu.iota {dimensions = array<i32: 0>} : vector<16x1xi32>
    %c8_i32 = arith.constant 8 : i32
    %c0_i32_17 = arith.constant 0 : i32
    %58 = arith.cmpi eq, %c8_i32, %c0_i32_17 : i32
    %c1_i32_18 = arith.constant 1 : i32
    %59 = arith.select %58, %c1_i32_18, %c8_i32 : i32
    %60 = vector.broadcast %59 : i32 to vector<16x1xi32>
    %61 = arith.remsi %57, %60 : vector<16x1xi32>
    %c0_i32_19 = arith.constant 0 : i32
    %62 = vector.broadcast %c0_i32_19 : i32 to vector<16x1xi32>
    %63 = arith.cmpi ne, %61, %62 : vector<16x1xi32>
    %c0_i32_20 = arith.constant 0 : i32
    %64 = vector.broadcast %c0_i32_20 : i32 to vector<16x1xi32>
    %65 = arith.cmpi slt, %61, %64 : vector<16x1xi32>
    %c0_i32_21 = arith.constant 0 : i32
    %66 = arith.cmpi slt, %59, %c0_i32_21 : i32
    %67 = vector.broadcast %66 : i1 to vector<16x1xi1>
    %68 = vector.broadcast %67 : vector<16x1xi1> to vector<16x1xi1>
    %69 = arith.xori %65, %68 : vector<16x1xi1>
    %70 = arith.andi %69, %63 : vector<16x1xi1>
    %71 = vector.broadcast %59 : i32 to vector<16x1xi32>
    %72 = arith.addi %61, %71 : vector<16x1xi32>
    %73 = arith.select %70, %72, %61 : vector<16x1xi1>, vector<16x1xi32>
    %c0_i32_22 = arith.constant 0 : i32
    %74 = vector.broadcast %c0_i32_22 : i32 to vector<16x1xi32>
    %75 = arith.cmpi ne, %73, %74 : vector<16x1xi32>
    %c1_i32_23 = arith.constant 1 : i32
    %76 = tpu.dynamic_rotate %56 by %c1_i32_23 dim 0 : vector<16x64xf32>, i32 -> vector<16x64xf32>
    %cst_24 = arith.constant 0.000000e+00 : f32
    %77 = vector.shape_cast %75 : vector<16x1xi1> to vector<16x1xi1>
    %78 = vector.broadcast %77 : vector<16x1xi1> to vector<16x64xi1>
    %79 = vector.broadcast %cst_24 : f32 to vector<16x64xf32>
    %80 = arith.select %78, %76, %79 : vector<16x64xi1>, vector<16x64xf32>
    %c7_i32 = arith.constant 7 : i32
    %81 = vector.broadcast %c7_i32 : i32 to vector<16x1xi32>
    %82 = arith.cmpi ne, %73, %81 : vector<16x1xi32>
    %c15_i32_25 = arith.constant 15 : i32
    %83 = tpu.dynamic_rotate %56 by %c15_i32_25 dim 0 : vector<16x64xf32>, i32 -> vector<16x64xf32>
    %cst_26 = arith.constant 0.000000e+00 : f32
    %84 = vector.shape_cast %82 : vector<16x1xi1> to vector<16x1xi1>
    %85 = vector.broadcast %84 : vector<16x1xi1> to vector<16x64xi1>
    %86 = vector.broadcast %cst_26 : f32 to vector<16x64xf32>
    %87 = arith.select %85, %83, %86 : vector<16x64xi1>, vector<16x64xf32>
    %88 = tpu.concatenate %80, %56, %87 in 1 : vector<16x64xf32>, vector<16x64xf32>, vector<16x64xf32> -> vector<16x192xf32>
    %89 = arith.truncf %88 : vector<16x192xf32> to vector<16x192xbf16>
    %c320 = arith.constant 320 : index
    %c0_27 = arith.constant 0 : index
    %90 = vector.load %arg1[%c320, %c0_27] : memref<1264x256xbf16, #tpu.memory_space<vmem>>, vector<192x64xbf16>
    %cst_28 = arith.constant dense<0.000000e+00> : vector<16x64xf32>
    %91 = tpu.matmul %89, %90, %cst_28 {dimension_numbers = #tpu.dot_dimension_numbers<[1], [0], [0], [1], [0, 0, 1, 1], [], []>} : vector<16x192xbf16>, vector<192x64xbf16>, vector<16x64xf32> -> vector<16x64xf32>
    %c8 = arith.constant 8 : index
    %c0_29 = arith.constant 0 : index
    %92 = vector.load %arg2[%c8, %c0_29] : memref<56x128xf32, #tpu.memory_space<vmem>>, vector<1x64xf32>
    %93 = vector.broadcast %92 : vector<1x64xf32> to vector<16x64xf32>
    %94 = arith.addf %91, %93 : vector<16x64xf32>
    %cst_30 = arith.constant 0.000000e+00 : f32
    %95 = vector.broadcast %cst_30 : f32 to vector<16x64xf32>
    %96 = arith.maximumf %94, %95 : vector<16x64xf32>
    %97 = tpu.iota {dimensions = array<i32: 0>} : vector<16x1xi32>
    %c8_i32_31 = arith.constant 8 : i32
    %c0_i32_32 = arith.constant 0 : i32
    %98 = arith.cmpi eq, %c8_i32_31, %c0_i32_32 : i32
    %c1_i32_33 = arith.constant 1 : i32
    %99 = arith.select %98, %c1_i32_33, %c8_i32_31 : i32
    %100 = vector.broadcast %99 : i32 to vector<16x1xi32>
    %101 = arith.remsi %97, %100 : vector<16x1xi32>
    %c0_i32_34 = arith.constant 0 : i32
    %102 = vector.broadcast %c0_i32_34 : i32 to vector<16x1xi32>
    %103 = arith.cmpi ne, %101, %102 : vector<16x1xi32>
    %c0_i32_35 = arith.constant 0 : i32
    %104 = vector.broadcast %c0_i32_35 : i32 to vector<16x1xi32>
    %105 = arith.cmpi slt, %101, %104 : vector<16x1xi32>
    %c0_i32_36 = arith.constant 0 : i32
    %106 = arith.cmpi slt, %99, %c0_i32_36 : i32
    %107 = vector.broadcast %106 : i1 to vector<16x1xi1>
    %108 = vector.broadcast %107 : vector<16x1xi1> to vector<16x1xi1>
    %109 = arith.xori %105, %108 : vector<16x1xi1>
    %110 = arith.andi %109, %103 : vector<16x1xi1>
    %111 = vector.broadcast %99 : i32 to vector<16x1xi32>
    %112 = arith.addi %101, %111 : vector<16x1xi32>
    %113 = arith.select %110, %112, %101 : vector<16x1xi1>, vector<16x1xi32>
    %c0_i32_37 = arith.constant 0 : i32
    %114 = vector.broadcast %c0_i32_37 : i32 to vector<16x1xi32>
    %115 = arith.cmpi ne, %113, %114 : vector<16x1xi32>
    %c1_i32_38 = arith.constant 1 : i32
    %116 = tpu.dynamic_rotate %96 by %c1_i32_38 dim 0 : vector<16x64xf32>, i32 -> vector<16x64xf32>
    %cst_39 = arith.constant 0.000000e+00 : f32
    %117 = vector.shape_cast %115 : vector<16x1xi1> to vector<16x1xi1>
    %118 = vector.broadcast %117 : vector<16x1xi1> to vector<16x64xi1>
    %119 = vector.broadcast %cst_39 : f32 to vector<16x64xf32>
    %120 = arith.select %118, %116, %119 : vector<16x64xi1>, vector<16x64xf32>
    %c7_i32_40 = arith.constant 7 : i32
    %121 = vector.broadcast %c7_i32_40 : i32 to vector<16x1xi32>
    %122 = arith.cmpi ne, %113, %121 : vector<16x1xi32>
    %c15_i32_41 = arith.constant 15 : i32
    %123 = tpu.dynamic_rotate %96 by %c15_i32_41 dim 0 : vector<16x64xf32>, i32 -> vector<16x64xf32>
    %cst_42 = arith.constant 0.000000e+00 : f32
    %124 = vector.shape_cast %122 : vector<16x1xi1> to vector<16x1xi1>
    %125 = vector.broadcast %124 : vector<16x1xi1> to vector<16x64xi1>
    %126 = vector.broadcast %cst_42 : f32 to vector<16x64xf32>
    %127 = arith.select %125, %123, %126 : vector<16x64xi1>, vector<16x64xf32>
    %128 = tpu.concatenate %120, %96, %127 in 1 : vector<16x64xf32>, vector<16x64xf32>, vector<16x64xf32> -> vector<16x192xf32>
    %129 = arith.truncf %128 : vector<16x192xf32> to vector<16x192xbf16>
    %c512 = arith.constant 512 : index
    %c0_43 = arith.constant 0 : index
    %130 = vector.load %arg1[%c512, %c0_43] : memref<1264x256xbf16, #tpu.memory_space<vmem>>, vector<192x64xbf16>
    %cst_44 = arith.constant dense<0.000000e+00> : vector<16x64xf32>
    %131 = tpu.matmul %129, %130, %cst_44 {dimension_numbers = #tpu.dot_dimension_numbers<[1], [0], [0], [1], [0, 0, 1, 1], [], []>} : vector<16x192xbf16>, vector<192x64xbf16>, vector<16x64xf32> -> vector<16x64xf32>
    %c16 = arith.constant 16 : index
    %c0_45 = arith.constant 0 : index
    %132 = vector.load %arg2[%c16, %c0_45] : memref<56x128xf32, #tpu.memory_space<vmem>>, vector<1x64xf32>
    %133 = vector.broadcast %132 : vector<1x64xf32> to vector<16x64xf32>
    %134 = arith.addf %131, %133 : vector<16x64xf32>
    %135 = arith.addf %134, %56 : vector<16x64xf32>
    %cst_46 = arith.constant 0.000000e+00 : f32
    %136 = vector.broadcast %cst_46 : f32 to vector<16x64xf32>
    %137 = arith.maximumf %135, %136 : vector<16x64xf32>
    %c704 = arith.constant 704 : index
    %c0_47 = arith.constant 0 : index
    %138 = vector.load %arg1[%c704, %c0_47] : memref<1264x256xbf16, #tpu.memory_space<vmem>>, vector<24x16xbf16>
    %139 = arith.truncf %137 : vector<16x64xf32> to vector<16x64xbf16>
    %cst_48 = arith.constant dense<0.000000e+00> : vector<24x64xf32>
    %140 = tpu.matmul %138, %139, %cst_48 {dimension_numbers = #tpu.dot_dimension_numbers<[1], [0], [0], [1], [0, 0, 1, 1], [], []>} : vector<24x16xbf16>, vector<16x64xbf16>, vector<24x64xf32> -> vector<24x64xf32>
    %141 = vector.extract_strided_slice %140 {offsets = [0, 0], sizes = [8, 64], strides = [1, 1]} : vector<24x64xf32> to vector<8x64xf32>
    %142 = vector.extract_strided_slice %140 {offsets = [8, 0], sizes = [8, 64], strides = [1, 1]} : vector<24x64xf32> to vector<8x64xf32>
    %143 = vector.extract_strided_slice %140 {offsets = [16, 0], sizes = [8, 64], strides = [1, 1]} : vector<24x64xf32> to vector<8x64xf32>
    %144 = tpu.concatenate %141, %142, %143 in 1 : vector<8x64xf32>, vector<8x64xf32>, vector<8x64xf32> -> vector<8x192xf32>
    %145 = arith.truncf %144 : vector<8x192xf32> to vector<8x192xbf16>
    %c736 = arith.constant 736 : index
    %c0_49 = arith.constant 0 : index
    %146 = vector.load %arg1[%c736, %c0_49] : memref<1264x256xbf16, #tpu.memory_space<vmem>>, vector<192x64xbf16>
    %cst_50 = arith.constant dense<0.000000e+00> : vector<8x64xf32>
    %147 = tpu.matmul %145, %146, %cst_50 {dimension_numbers = #tpu.dot_dimension_numbers<[1], [0], [0], [1], [0, 0, 1, 1], [], []>} : vector<8x192xbf16>, vector<192x64xbf16>, vector<8x64xf32> -> vector<8x64xf32>
    %c24 = arith.constant 24 : index
    %c0_51 = arith.constant 0 : index
    %148 = vector.load %arg2[%c24, %c0_51] : memref<56x128xf32, #tpu.memory_space<vmem>>, vector<1x64xf32>
    %149 = vector.broadcast %148 : vector<1x64xf32> to vector<8x64xf32>
    %150 = arith.addf %147, %149 : vector<8x64xf32>
    %cst_52 = arith.constant 0.000000e+00 : f32
    %151 = vector.broadcast %cst_52 : f32 to vector<8x64xf32>
    %152 = arith.maximumf %150, %151 : vector<8x64xf32>
    %153 = vector.extract_strided_slice %140 {offsets = [8, 0], sizes = [8, 64], strides = [1, 1]} : vector<24x64xf32> to vector<8x64xf32>
    %154 = arith.truncf %153 : vector<8x64xf32> to vector<8x64xbf16>
    %c928 = arith.constant 928 : index
    %c0_53 = arith.constant 0 : index
    %155 = vector.load %arg1[%c928, %c0_53] : memref<1264x256xbf16, #tpu.memory_space<vmem>>, vector<64x64xbf16>
    %cst_54 = arith.constant dense<0.000000e+00> : vector<8x64xf32>
    %156 = tpu.matmul %154, %155, %cst_54 {dimension_numbers = #tpu.dot_dimension_numbers<[1], [0], [0], [1], [0, 0, 1, 1], [], []>} : vector<8x64xbf16>, vector<64x64xbf16>, vector<8x64xf32> -> vector<8x64xf32>
    %c32 = arith.constant 32 : index
    %c0_55 = arith.constant 0 : index
    %157 = vector.load %arg2[%c32, %c0_55] : memref<56x128xf32, #tpu.memory_space<vmem>>, vector<1x64xf32>
    %158 = vector.broadcast %157 : vector<1x64xf32> to vector<8x64xf32>
    %159 = arith.addf %156, %158 : vector<8x64xf32>
    %160 = tpu.iota {dimensions = array<i32: 0>} : vector<8x1xi32>
    %c4_i32 = arith.constant 4 : i32
    %c0_i32_56 = arith.constant 0 : i32
    %161 = arith.cmpi eq, %c4_i32, %c0_i32_56 : i32
    %c1_i32_57 = arith.constant 1 : i32
    %162 = arith.select %161, %c1_i32_57, %c4_i32 : i32
    %163 = vector.broadcast %162 : i32 to vector<8x1xi32>
    %164 = arith.remsi %160, %163 : vector<8x1xi32>
    %c0_i32_58 = arith.constant 0 : i32
    %165 = vector.broadcast %c0_i32_58 : i32 to vector<8x1xi32>
    %166 = arith.cmpi ne, %164, %165 : vector<8x1xi32>
    %c0_i32_59 = arith.constant 0 : i32
    %167 = vector.broadcast %c0_i32_59 : i32 to vector<8x1xi32>
    %168 = arith.cmpi slt, %164, %167 : vector<8x1xi32>
    %c0_i32_60 = arith.constant 0 : i32
    %169 = arith.cmpi slt, %162, %c0_i32_60 : i32
    %170 = vector.broadcast %169 : i1 to vector<8x1xi1>
    %171 = vector.broadcast %170 : vector<8x1xi1> to vector<8x1xi1>
    %172 = arith.xori %168, %171 : vector<8x1xi1>
    %173 = arith.andi %172, %166 : vector<8x1xi1>
    %174 = vector.broadcast %162 : i32 to vector<8x1xi32>
    %175 = arith.addi %164, %174 : vector<8x1xi32>
    %176 = arith.select %173, %175, %164 : vector<8x1xi1>, vector<8x1xi32>
    %c0_i32_61 = arith.constant 0 : i32
    %177 = vector.broadcast %c0_i32_61 : i32 to vector<8x1xi32>
    %178 = arith.cmpi ne, %176, %177 : vector<8x1xi32>
    %c1_i32_62 = arith.constant 1 : i32
    %179 = tpu.dynamic_rotate %152 by %c1_i32_62 dim 0 : vector<8x64xf32>, i32 -> vector<8x64xf32>
    %cst_63 = arith.constant 0.000000e+00 : f32
    %180 = vector.shape_cast %178 : vector<8x1xi1> to vector<8x1xi1>
    %181 = vector.broadcast %180 : vector<8x1xi1> to vector<8x64xi1>
    %182 = vector.broadcast %cst_63 : f32 to vector<8x64xf32>
    %183 = arith.select %181, %179, %182 : vector<8x64xi1>, vector<8x64xf32>
    %c3_i32 = arith.constant 3 : i32
    %184 = vector.broadcast %c3_i32 : i32 to vector<8x1xi32>
    %185 = arith.cmpi ne, %176, %184 : vector<8x1xi32>
    %c7_i32_64 = arith.constant 7 : i32
    %186 = tpu.dynamic_rotate %152 by %c7_i32_64 dim 0 : vector<8x64xf32>, i32 -> vector<8x64xf32>
    %cst_65 = arith.constant 0.000000e+00 : f32
    %187 = vector.shape_cast %185 : vector<8x1xi1> to vector<8x1xi1>
    %188 = vector.broadcast %187 : vector<8x1xi1> to vector<8x64xi1>
    %189 = vector.broadcast %cst_65 : f32 to vector<8x64xf32>
    %190 = arith.select %188, %186, %189 : vector<8x64xi1>, vector<8x64xf32>
    %191 = tpu.concatenate %183, %152, %190 in 1 : vector<8x64xf32>, vector<8x64xf32>, vector<8x64xf32> -> vector<8x192xf32>
    %192 = arith.truncf %191 : vector<8x192xf32> to vector<8x192xbf16>
    %c992 = arith.constant 992 : index
    %c0_66 = arith.constant 0 : index
    %193 = vector.load %arg1[%c992, %c0_66] : memref<1264x256xbf16, #tpu.memory_space<vmem>>, vector<192x64xbf16>
    %cst_67 = arith.constant dense<0.000000e+00> : vector<8x64xf32>
    %194 = tpu.matmul %192, %193, %cst_67 {dimension_numbers = #tpu.dot_dimension_numbers<[1], [0], [0], [1], [0, 0, 1, 1], [], []>} : vector<8x192xbf16>, vector<192x64xbf16>, vector<8x64xf32> -> vector<8x64xf32>
    %c40 = arith.constant 40 : index
    %c0_68 = arith.constant 0 : index
    %195 = vector.load %arg2[%c40, %c0_68] : memref<56x128xf32, #tpu.memory_space<vmem>>, vector<1x64xf32>
    %196 = vector.broadcast %195 : vector<1x64xf32> to vector<8x64xf32>
    %197 = arith.addf %194, %196 : vector<8x64xf32>
    %198 = arith.addf %197, %159 : vector<8x64xf32>
    %cst_69 = arith.constant 0.000000e+00 : f32
    %199 = vector.broadcast %cst_69 : f32 to vector<8x64xf32>
    %200 = arith.maximumf %198, %199 : vector<8x64xf32>
    %c1184 = arith.constant 1184 : index
    %c0_70 = arith.constant 0 : index
    %201 = vector.load %arg1[%c1184, %c0_70] : memref<1264x256xbf16, #tpu.memory_space<vmem>>, vector<2x8xbf16>
    %202 = arith.truncf %200 : vector<8x64xf32> to vector<8x64xbf16>
    %cst_71 = arith.constant dense<0.000000e+00> : vector<2x64xf32>
    %203 = tpu.matmul %201, %202, %cst_71 {dimension_numbers = #tpu.dot_dimension_numbers<[1], [0], [0], [1], [0, 0, 1, 1], [], []>} : vector<2x8xbf16>, vector<8x64xbf16>, vector<2x64xf32> -> vector<2x64xf32>
    %204 = arith.truncf %203 : vector<2x64xf32> to vector<2x64xbf16>
    %c1200 = arith.constant 1200 : index
    %c0_72 = arith.constant 0 : index
    %205 = vector.load %arg1[%c1200, %c0_72] : memref<1264x256xbf16, #tpu.memory_space<vmem>>, vector<64x10xbf16>
    %cst_73 = arith.constant dense<0.000000e+00> : vector<2x10xf32>
    %206 = tpu.matmul %204, %205, %cst_73 {dimension_numbers = #tpu.dot_dimension_numbers<[1], [0], [0], [1], [0, 0, 1, 1], [], []>} : vector<2x64xbf16>, vector<64x10xbf16>, vector<2x10xf32> -> vector<2x10xf32>
    %c48 = arith.constant 48 : index
    %c0_74 = arith.constant 0 : index
    %207 = vector.load %arg2[%c48, %c0_74] : memref<56x128xf32, #tpu.memory_space<vmem>>, vector<1x10xf32>
    %208 = vector.broadcast %207 : vector<1x10xf32> to vector<2x10xf32>
    %209 = arith.addf %206, %208 : vector<2x10xf32>
    %c0_75 = arith.constant 0 : index
    %c0_76 = arith.constant 0 : index
    %210 = vector.load %arg3[%c0_75, %c0_76] : memref<2x10xf32, #tpu.memory_space<vmem>>, vector<2x10xf32>
    tpu.vector_store %arg3[%c0_75, %c0_76], %209 {strides = array<i32>} : memref<2x10xf32, #tpu.memory_space<vmem>>, vector<2x10xf32>,
    return
  }
}

</mosaic_0001>

<bundles_post_ra>
// kernel: forward.1
= control target key start
LH: loop header
LB: loop body
LE: loop exit
PB: predicated region body
PF: predicated region fallthrough
CT: control target
= control target key end

     0   :  { %8 = vsyncpa [#allocation3], 0  ;;  %s2284_s0 = inlined_call_operand.vmem [shape: f32[32,48], index: 0, kind: input, shape index: {}]   ;;  %s2285_s1 = inlined_call_operand.hbm [shape: bf16[1264,256], index: 1, kind: input, shape index: {}]   ;;  %s2286_s2 = inlined_call_operand.vmem [shape: f32[56,128], index: 2, kind: input, shape index: {}]   ;;  %s2287_s3 = inlined_call_operand.hbm [shape: f32[2,10], index: 3, kind: output, shape index: {}]  }
   0x1   :  { %9 = vsyncpa [#allocation4], 0  ;;  %s1969_s12 = smov [#allocation2]   ;;  %s1921_s16 = scalar_lea.hbm %s2285_s1, 20224 }
   0x2   :  { %s17_s13 = sshll.u32 %s1969_s12, 4  ;;  %p1922_p0 = scmp.ne.s32.totalorder %s2285_s1, %s1921_s16  ;;  %s18_s13 = int_to_ptr.vmem [resolvable:$true] %s17_s13 }
   0x3   :  { %p1925_p1 = scmp.lt.u32.totalorder %s1921_s16, %s2285_s1 }
   0x5   :  { %p1927_p2 = pnand %p1925_p1, %p1922_p0 }
   0x7   :  { %1930 = shalt.err (!%p1927_p2)
}
   0x8   :  { %s1931_s21 = scalar_lea.vmem %s18_s13, 20224  ;;  %p1936_p4 = scmp.lt.s32.totalorder %s18_s13, %s18_s13 }
   0x9   :  { %p1932_p3 = scmp.ne.s32.totalorder %s18_s13, %s1931_s21  ;;  %p1937_p5 = scmp.lt.s32.totalorder %s1931_s21, %s1931_s21 }
   0xb   :  { %p1938_p6 = por %p1937_p5, %p1936_p4 }
   0xd   :  { %p1939_p7 = pnand %p1938_p6, %p1932_p3 }
   0xf   :  { %1942 = shalt.err (!%p1939_p7)
}
  0x10   :  { %s1970_s22 = smov 128   ;;  %s1971_s23 = smov 8  }
  0x11   :  { %23 = dma.hbm_to_vmem [thread:$0]  %s2285_s1, 20224, %s18_s13, [#allocation3], %s1970_s22, %s1970_s22, %s1971_s23  }
  0x12   :  { %1965 = dma.done.wait [#allocation3], 20224  }
  0x13   :  { %1966 = vsyncadd [#allocation3], 4294947072  ;;  %v34_v0 = vlaneseq  ;;  %v1972_v1 = vmov 0   ;;  %v30_v7 = vld [vmem:[%s2284_s0] sm:$0xff]  ;;  %v31_v8 = vld [vmem:[%s2284_s0 + $0x8] sm:$0xff]  ;;  %s1973_s6 = smov 48  }
  0x14   :  { %267 = vmatprep.subr.bf16.mxu0 %v1972_v1  ;;  %450 = vmatprep.mubr.bf16.mxu1 %v1972_v1  ;;  %v32_v9 = vld [vmem:[%s2284_s0 + $0x10] sm:$0xff]  ;;  %v92_v10 = vrot.slane %v31_v8, 7  ;;  %v117_v11 = vrot.slane %v31_v8, 1  ;;  %v1787_v12 = vpack.i.bf16 %v31_v8, %v30_v7  ;;  %v91_v13 = vrot.slane %v30_v7, 7  ;;  %v33_v14 = vld [vmem:[%s2284_s0 + $0x18] sm:$0xff]  ;;  %s1974_s0 = smov 96  }
  0x15   :  { %v2013_v2 = vshrl.u32 %v34_v0, 7  ;;  %v116_v15 = vrot.slane %v30_v7, 1  ;;  %v118_v17 = vrot.slane %v32_v9, 1  ;;  %v94_v18 = vrot.slane %v33_v14, 7  ;;  %v1827_v21 = vld [vmem:[#allocation2] ss:$8 sps:$4 sm:$0xff]  }
  0x16   :  { %1788 = vrot.lane.b32.xlu0 %v1787_v12, %s1973_s6  ;;  %v119_v19 = vrot.slane %v33_v14, 1  ;;  %v1797_v20 = vpack.i.bf16 %v33_v14, %v32_v9  ;;  %268 = vmatpush1.bf16.msra.mxu0 %v1827_v21  ;;  %v1828_v29 = vld [vmem:[#allocation2 + $0x10] ss:$8 sps:$4 sm:$0xff]   ;;  %v1829_v33 = vld [vmem:[#allocation2 + $0x20] ss:$8 sps:$4 sm:$0xff]   ;;  %v93_v34 = vrot.slane %v32_v9, 7 }
  0x17   :  { %v2016_v3 = vadd.s32 8, %v2013_v2  ;;  %v38_v4 = vadd.s32 24, %v2013_v2  ;;  %vm120_vm0 = vcmp.lt.s32.totalorder %v2013_v2, 7  ;;  %vm95_vm1 = vcmp.lt.s32.totalorder %v2013_v2, 1  ;;  %269 = vmatprep.subr.bf16.mxu0 %v1972_v1  ;;  %v1830_v35 = vld [vmem:[#allocation2 + $0x30] ss:$8 sps:$4 sm:$0xff]  }
  0x18   :  { %v2040_v22 = vsel %vm95_vm1, %v91_v13, %v92_v10  ;;  %v122_v23 = vsel %vm120_vm0, %v117_v11, %v118_v17  ;;  %v123_v24 = vsel %vm120_vm0, %v116_v15, %v117_v11  ;;  %v2048_v25 = vsel %vm95_vm1, %v94_v18, %v91_v13  ;;  %1798 = vrot.lane.b32.xlu1 %v1797_v20, %s1973_s6  ;;  %v1836_v38 = vld [vmem:[#allocation2 + $0x94] ss:$8 sps:$4 sm:$0xff]   ;;  %v1838_v39 = vld [vmem:[#allocation2 + $0x90] ss:$8 sps:$4 sm:$0xff]   ;;  %v1839_v40 = vld [vmem:[#allocation2 + $0xa4] ss:$8 sps:$4 sm:$0xff]  }
  0x19   :  { %v50_v5 = vand.u32 15, %v2016_v3  ;;  %v64_v6 = vand.u32 15, %v38_v4  ;;  %v121_v27 = vsel %vm120_vm0, %v118_v17, %v119_v19  ;;  %v124_v28 = vsel %vm120_vm0, %v119_v19, %v116_v15  ;;  %418 = vmatprep.subr.bf16.mxu1 %v1836_v38  ;;  %v1841_v41 = vld [vmem:[#allocation2 + $0xa0] ss:$8 sps:$4 sm:$0xff]   ;;  %v1842_v43 = vld [vmem:[#allocation2 + $0xb4] ss:$8 sps:$4 sm:$0xff]  }
  0x1a   :  { %270 = vmatpush1.bf16.msra.mxu0 %v1828_v29  ;;  %v2060_v36 = vsel %vm95_vm1, %v93_v34, %v94_v18  ;;  %v2064_v37 = vsel %vm95_vm1, %v92_v10, %v93_v34  ;;  %419 = vmatpush1.bf16.msra.mxu1 %v1838_v39  ;;  %v1831_v42 = vld [vmem:[#allocation2 + $0x40] ss:$8 sps:$4 sm:$0xff]   ;;  %v1832_v44 = vld [vmem:[#allocation2 + $0x50] ss:$8 sps:$4 sm:$0xff]   ;;  %v1845_v46 = vld [vmem:[#allocation2 + $0xc4] ss:$8 sps:$4 sm:$0xff]  }
  0x1b   :  { %vm2034_vm2 = vcmp.ne.s32.totalorder %v50_v5, 15  ;;  %vm115_vm3 = vcmp.ne.s32.totalorder %v64_v6, 15  ;;  %271 = vmatprep.subr.bf16.mxu0 %v1972_v1  ;;  %420 = vmatprep.subr.bf16.mxu1 %v1839_v40  ;;  %v1844_v45 = vld [vmem:[#allocation2 + $0xb0] ss:$8 sps:$4 sm:$0xff]   ;;  %v1847_v47 = vld [vmem:[#allocation2 + $0xc0] ss:$8 sps:$4 sm:$0xff]  }
  0x1c   :  { %v134_v26 = vsel %vm2034_vm2, %v122_v23, 0.0  ;;  %v136_v31 = vsel %vm115_vm3, %v124_v28, 0.0  ;;  %v1833_v48 = vld [vmem:[#allocation2 + $0x60] ss:$8 sps:$4 sm:$0xff]   ;;  %v1848_v49 = vld [vmem:[#allocation2 + $0xd4] ss:$8 sps:$4 sm:$0xff]  }
  0x1d   :  { %v1792_v30 = vpack.i.bf16 %v134_v26, %v123_v24  ;;  %v1802_v32 = vpack.i.bf16 %v136_v31, %v121_v27  ;;  %v1850_v50 = vld [vmem:[#allocation2 + $0xd0] ss:$8 sps:$4 sm:$0xff]   ;;  %v1851_v52 = vld [vmem:[#allocation2 + $0xe4] ss:$8 sps:$4 sm:$0xff]   ;;  %v1853_v53 = vld [vmem:[#allocation2 + $0xe0] ss:$8 sps:$4 sm:$0xff]  }
  0x1e   :  { %272 = vmatpush1.bf16.msra.mxu0 %v1829_v33  ;;  %421 = vmatpush1.bf16.msra.mxu1 %v1841_v41  ;;  %v1834_v51 = vld [vmem:[#allocation2 + $0x70] ss:$8 sps:$4 sm:$0xff]   ;;  %v1835_v54 = vld [vmem:[#allocation2 + $0x80] ss:$8 sps:$4 sm:$0xff]   ;;  %v37_v55 = vadd.s32 16, %v2013_v2  ;;  %v43_v57 = vand.u32 15, %v2013_v2 }
  0x1f   :  { %1793 = vrot.lane.b32.xlu0 %v1792_v30, %s1974_s0  ;;  %1803 = vrot.lane.b32.xlu1 %v1802_v32, %s1974_s0  ;;  %vm169_vm6 = vcmask 392192   ;;  %vm260_vm7 = vcmask 130048   ;;  %vm174_vm8 = vcmask 785408   ;;  %v1856_v26 = vld [vmem:[#allocation2 + $0xf0] ss:$8 sps:$4 sm:$0xff]   ;;  %s1976_s9 = smov 64  }
  0x20   :  { %273 = vmatprep.subr.bf16.mxu0 %v1972_v1  ;;  %422 = vmatprep.subr.bf16.mxu1 %v1842_v43  ;;  %v57_v56 = vand.u32 15, %v37_v55  ;;  %vm2079_vm5 = vcmp.ne.s32.totalorder %v43_v57, 0  ;;  %v1857_v27 = vld [vmem:[#allocation2 + $0x104] ss:$8 sps:$4 sm:$0xff]   ;;  %v1859_v28 = vld [vmem:[#allocation2 + $0x100] ss:$8 sps:$4 sm:$0xff]  }
  0x21   :  { %v108_v6 = vsel %vm2079_vm5, %v2048_v25, 0.0  ;;  %v1592_v29 = vld [vmem:[%s2286_s2] ss:$0 sm:$0xff]  ;;  %vm1977_vm9 = vmmov 0   ;;  %vm518_vm10 = vcmask 261120   ;;  %vm645_vm13 = vcmask 523264  }
  0x22   :  { %274 = vmatpush1.bf16.msra.mxu0 %v1830_v35  ;;  %423 = vmatpush1.bf16.msra.mxu1 %v1844_v45  ;;  %vm2075_vm4 = vcmp.ne.s32.totalorder %v57_v56, 0  ;;  %vm1450_vm2 = vcmask 1043456   ;;  %vm1446_vm3 = vcmask 64512   ;;  %s1978_s22 = smov [#allocation5]  }
  0x23   :  { %275 = vmatprep.subr.bf16.mxu0 %v1972_v1  ;;  %424 = vmatprep.subr.bf16.mxu1 %v1845_v46  ;;  %v110_v62 = vsel %vm2075_vm4, %v2064_v37, 0.0  ;;  %s1583_s23 = sshll.u32 %s1978_s22, 4  ;;  %vm1575_vm4 = vcmask 74752   ;;  %s1584_s23 = int_to_ptr.vmem [resolvable:$true] %s1583_s23 }
  0x24   :  { %s1943_s24 = scalar_lea.vmem %s1584_s23, 32  ;;  %p1948_p9 = scmp.lt.s32.totalorder %s1584_s23, %s1584_s23 }
  0x25   :  { %p1944_p8 = scmp.ne.s32.totalorder %s1584_s23, %s1943_s24  ;;  %p1949_p10 = scmp.lt.s32.totalorder %s1943_s24, %s1943_s24 }
  0x26   :  { %276 = vmatpush1.bf16.msra.mxu0 %v1831_v42  ;;  %425 = vmatpush1.bf16.msra.mxu1 %v1847_v47 }
  0x27   :  { %277 = vmatprep.subr.bf16.mxu0 %v1972_v1  ;;  %426 = vmatprep.subr.bf16.mxu1 %v1848_v49  ;;  %p1950_p11 = por %p1949_p10, %p1948_p9 }
  0x29   :  { %p1951_p12 = pnand %p1950_p11, %p1944_p8 }
  0x2a   :  { %278 = vmatpush1.bf16.msra.mxu0 %v1832_v44  ;;  %427 = vmatpush1.bf16.msra.mxu1 %v1850_v50 }
  0x2b   :  { %279 = vmatprep.subr.bf16.mxu0 %v1972_v1  ;;  %428 = vmatprep.subr.bf16.mxu1 %v1851_v52 }
  0x2e   :  { %280 = vmatpush1.bf16.msra.mxu0 %v1833_v48  ;;  %429 = vmatpush1.bf16.msra.mxu1 %v1853_v53  ;;  %v1975_v48 = vmov 0.0  }
  0x2f   :  { %281 = vmatprep.subr.bf16.mxu0 %v1972_v1 }
  0x32   :  { %282 = vmatpush1.bf16.msra.mxu0 %v1834_v51 }
  0x33   :  { %283 = vmatprep.subr.bf16.mxu0 %v1972_v1 }
  0x36   :  { %284 = vmatpush1.bf16.msra.mxu0 %v1835_v54 }
  0x37   :  { %754 = vmatprep.subr.bf16.mxu0 %v1972_v1 }
  0x88   :  { %v1789_v59 = vpop.permute.xlu0 %1788 }
  0x89   :  { %v1791_v63 = vunpack.i.h.bf16 %v1789_v59  ;;  %v1790_v0 = vunpack.i.l.bf16 %v1789_v59 }
  0x8a   :  { %v1799_v61 = vpop.permute.xlu1 %1798 }
  0x8b   :  { %v1801_v4 = vunpack.i.h.bf16 %v1799_v61  ;;  %v1800_v5 = vunpack.i.l.bf16 %v1799_v61  ;;  %v170_v13 = vsel %vm169_vm6, %v108_v6, %v1790_v0  ;;  %v171_v14 = vsel %vm169_vm6, %v2040_v22, %v1791_v63  ;;  %v1854_v22 = vld [vmem:[#allocation2 + $0xf4] ss:$8 sps:$4 sm:$0xff]  }
  0x8c   :  { %430 = vmatprep.subr.bf16.mxu1 %v1854_v22  ;;  %v1871_v22 = vld [vmem:[#allocation2 + $0x1c0] ss:$8 sps:$4 sm:$0xff]  }
  0x8d   :  { %v172_v10 = vsel %vm169_vm6, %v110_v62, %v1800_v5  ;;  %v173_v11 = vsel %vm169_vm6, %v2060_v36, %v1801_v4  ;;  %431 = vmatpush1.bf16.msra.mxu1 %v1856_v26  ;;  %v1872_v26 = vld [vmem:[#allocation2 + $0x1d0] ss:$8 sps:$4 sm:$0xff]  }
  0x8e   :  { %432 = vmatprep.subr.bf16.mxu1 %v1857_v27  ;;  %v1873_v27 = vld [vmem:[#allocation2 + $0x1e0] ss:$8 sps:$4 sm:$0xff]  }
  0x91   :  { %v1794_v7 = vpop.permute.xlu0 %1793  ;;  %v1804_v12 = vpop.permute.xlu1 %1803  ;;  %433 = vmatpush1.bf16.msra.mxu1 %v1859_v28 }
  0x92   :  { %v1796_v8 = vunpack.i.h.bf16 %v1794_v7  ;;  %v1795_v9 = vunpack.i.l.bf16 %v1794_v7  ;;  %v1806_v15 = vunpack.i.h.bf16 %v1804_v12  ;;  %v1805_v16 = vunpack.i.l.bf16 %v1804_v12  ;;  %1719 = vmatprep.subr.bf16.mxu1 %v1975_v48 }
  0x94   :  { %v180_v17 = vpack.c.bf16 %v1796_v8, %v1795_v9  ;;  %v175_v18 = vsel %vm174_vm8, %v170_v13, %v1795_v9  ;;  %v176_v19 = vsel %vm174_vm8, %v171_v14, %v1796_v8  ;;  %v182_v20 = vpack.c.bf16 %v1806_v15, %v1805_v16  ;;  %v1860_v14 = vld [vmem:[#allocation2 + $0x110] ss:$8 sps:$4 sm:$0xff]  }
  0x95   :  { %v179_v21 = vpack.c.bf16 %v176_v19, %v175_v18  ;;  %v177_v23 = vsel %vm174_vm8, %v172_v10, %v1805_v16  ;;  %v178_v24 = vsel %vm174_vm8, %v173_v11, %v1806_v15  ;;  %v1861_v15 = vld [vmem:[#allocation2 + $0x120] ss:$8 sps:$4 sm:$0xff]   ;;  %v1862_v16 = vld [vmem:[#allocation2 + $0x130] ss:$8 sps:$4 sm:$0xff]  }
  0x96   :  { %1602 = vmatprep.mubr.msk.bf16.mxu0 %vm260_vm7, %v180_v17  ;;  %v181_v25 = vpack.c.bf16 %v178_v24, %v177_v23  ;;  %v1863_v17 = vld [vmem:[#allocation2 + $0x140] ss:$8 sps:$4 sm:$0xff]   ;;  %v1864_v18 = vld [vmem:[#allocation2 + $0x150] ss:$8 sps:$4 sm:$0xff]  }
  0x97   :  { %300 = vmatmul.mubr.bf16.vlgmr.msra.gmra.mrb[0].mxu0 %v179_v21  ;;  %v1865_v19 = vld [vmem:[#allocation2 + $0x160] ss:$8 sps:$4 sm:$0xff]   ;;  %v1868_v23 = vld [vmem:[#allocation2 + $0x190] ss:$8 sps:$4 sm:$0xff]  }
  0x98   :  { %1603 = vmatprep.mubr.msk.bf16.mxu0 %vm260_vm7, %v182_v20  ;;  %755 = vmatpush1.bf16.msra.mxu0 %v1863_v17  ;;  %v1866_v20 = vld [vmem:[#allocation2 + $0x170] ss:$8 sps:$4 sm:$0xff]   ;;  %v1867_v21 = vld [vmem:[#allocation2 + $0x180] ss:$8 sps:$4 sm:$0xff]  }
  0x99   :  { %756 = vmatprep.subr.bf16.mxu0 %v1972_v1  ;;  %v1869_v24 = vld [vmem:[#allocation2 + $0x1a0] ss:$8 sps:$4 sm:$0xff]   ;;  %v1882_v17 = vld [vmem:[#allocation2 + $0x270] ss:$8 sps:$4 sm:$0xff]  }
  0x9c   :  { %757 = vmatpush1.bf16.msra.mxu0 %v1864_v18  ;;  %v1883_v18 = vld [vmem:[#allocation2 + $0x280] ss:$8 sps:$4 sm:$0xff]  }
  0x9d   :  { %758 = vmatprep.subr.bf16.mxu0 %v1972_v1 }
  0x9f   :  { %308 = vmatmul.mubr.bf16.gmra.mrb[4].mxu0 %v181_v25  ;;  %v1870_v25 = vld [vmem:[#allocation2 + $0x1b0] ss:$8 sps:$4 sm:$0xff]  }
  0xa0   :  { %759 = vmatpush1.bf16.msra.mxu0 %v1865_v19  ;;  %v1884_v19 = vld [vmem:[#allocation2 + $0x290] ss:$8 sps:$4 sm:$0xff]  }
  0xa1   :  { %760 = vmatprep.subr.bf16.mxu0 %v1972_v1 }
  0xa4   :  { %761 = vmatpush1.bf16.msra.mxu0 %v1866_v20  ;;  %v1885_v20 = vld [vmem:[#allocation2 + $0x2a0] ss:$8 sps:$4 sm:$0xff]  }
  0xa5   :  { %762 = vmatprep.subr.bf16.mxu0 %v1972_v1 }
  0xa8   :  { %763 = vmatpush1.bf16.msra.mxu0 %v1867_v21  ;;  %v1886_v21 = vld [vmem:[#allocation2 + $0x2b0] ss:$8 sps:$4 sm:$0xff]  }
  0xa9   :  { %764 = vmatprep.subr.bf16.mxu0 %v1972_v1 }
  0xac   :  { %765 = vmatpush1.bf16.msra.mxu0 %v1868_v23  ;;  %v1626_v23 = vld [vmem:[%s2286_s2 + $0x8] ss:$0 sm:$0xff] }
  0xad   :  { %766 = vmatprep.subr.bf16.mxu0 %v1972_v1 }
  0xb0   :  { %767 = vmatpush1.bf16.msra.mxu0 %v1869_v24 }
  0xb1   :  { %768 = vmatprep.subr.bf16.mxu0 %v1972_v1 }
  0xb4   :  { %769 = vmatpush1.bf16.msra.mxu0 %v1870_v25 }
  0xb5   :  { %770 = vmatprep.subr.bf16.mxu0 %v1972_v1 }
  0xb8   :  { %771 = vmatpush1.bf16.msra.mxu0 %v1871_v22 }
  0xb9   :  { %772 = vmatprep.subr.bf16.mxu0 %v1972_v1 }
  0xbc   :  { %773 = vmatpush1.bf16.msra.mxu0 %v1872_v26 }
  0xbd   :  { %774 = vmatprep.subr.bf16.mxu0 %v1972_v1 }
  0xc0   :  { %775 = vmatpush1.bf16.msra.mxu0 %v1873_v27 }
  0xc1   :  { %776 = vmatprep.subr.bf16.mxu0 %v1972_v1 }
 0x16a   :  { %v301_v30 = vpop.f32.mrb[0].mxu0 }
 0x16b   :  { %v302_v31 = vadd.f32 %v1592_v29, %v301_v30  ;;  %v303_v32 = vpop.f32.mrb[1].mxu0 }
 0x16c   :  { %v304_v33 = vpop.f32.mrb[2].mxu0 }
 0x16d   :  { %v305_v34 = vadd.f32 %v1592_v29, %v304_v33  ;;  %v306_v35 = vpop.f32.mrb[3].mxu0  ;;  %v316_v36 = vmax.f32 %v302_v31, 0.0 }
 0x16f   :  { %v317_v37 = vmax.f32 %v305_v34, 0.0 }
 0x171   :  { %v320_v38 = vpack.c.bf16 %v317_v37, %v316_v36  ;;  %v1874_v36 = vld [vmem:[#allocation2 + $0x1f0] ss:$8 sps:$4 sm:$0xff]  }
 0x172   :  { %v309_v39 = vpop.f32.mrb[4].mxu0  ;;  %777 = vmatpush1.bf16.msra.mxu0 %v1874_v36 }
 0x173   :  { %v310_v40 = vadd.f32 %v1592_v29, %v309_v39  ;;  %v311_v41 = vpop.f32.mrb[5].mxu0  ;;  %451 = vmatmul.mubr.bf16.vlgmr.msra.gmra.mrb[0].mxu1 %v320_v38 }
 0x174   :  { %v312_v42 = vpop.f32.mrb[6].mxu0  ;;  %460 = vmatprep.mubr.bf16.mxu1 %v1972_v1  ;;  %v600_v41 = vand.u32 7, %v2016_v3  ;;  %v1887_v3 = vld [vmem:[#allocation2 + $0x2c0] ss:$8 sps:$4 sm:$0xff]  }
 0x175   :  { %v313_v43 = vadd.f32 %v1592_v29, %v312_v42  ;;  %v314_v44 = vpop.f32.mrb[7].mxu0  ;;  %v318_v45 = vmax.f32 %v310_v40, 0.0  ;;  %v593_v40 = vand.u32 7, %v2013_v2 }
 0x176   :  { %vm2137_vm12 = vcmp.ne.s32.totalorder %v600_v41, 7  ;;  %vm2157_vm15 = vcmp.ne.s32.totalorder %v600_v41, 0 }
 0x177   :  { %v319_v46 = vmax.f32 %v313_v43, 0.0  ;;  %vm2129_vm11 = vcmp.ne.s32.totalorder %v593_v40, 7  ;;  %vm2153_vm14 = vcmp.ne.s32.totalorder %v593_v40, 0 }
 0x179   :  { %v321_v47 = vpack.c.bf16 %v319_v46, %v318_v45 }
 0x17b   :  { %461 = vmatmul.mubr.bf16.gmra.mrb[4].mxu1 %v321_v47 }
 0x17c   :  { %1723 = vmatprep.mubr.msk.bf16.mxu1 %vm1977_vm9, %v1975_v48 }
 0x246   :  { %v452_v49 = vpop.f32.mrb[0].mxu1 }
 0x247   :  { %v454_v50 = vpop.f32.mrb[1].mxu1 }
 0x248   :  { %v456_v51 = vpop.f32.mrb[2].mxu1 }
 0x249   :  { %v1807_v52 = vpack.i.bf16 %v456_v51, %v452_v49  ;;  %v458_v53 = vpop.f32.mrb[3].mxu1 }
 0x24b   :  { %1808 = vrot.lane.b32.xlu0 %v1807_v52, %s1976_s9 }
 0x24e   :  { %v462_v54 = vpop.f32.mrb[4].mxu1 }
 0x24f   :  { %v464_v55 = vpop.f32.mrb[5].mxu1 }
 0x250   :  { %v466_v56 = vpop.f32.mrb[6].mxu1 }
 0x251   :  { %v1812_v57 = vpack.i.bf16 %v466_v56, %v462_v54  ;;  %v468_v58 = vpop.f32.mrb[7].mxu1 }
 0x253   :  { %1813 = vrot.lane.b32.xlu1 %v1812_v57, %s1976_s9 }
 0x2bd   :  { %v1809_v59 = vpop.permute.xlu0 %1808 }
 0x2be   :  { %v1811_v60 = vunpack.i.h.bf16 %v1809_v59  ;;  %v1810_v61 = vunpack.i.l.bf16 %v1809_v59 }
 0x2c0   :  { %v488_v62 = vmax.f32 %v456_v51, %v1811_v60  ;;  %v487_v63 = vmax.f32 %v452_v49, %v1810_v61 }
 0x2c2   :  { %v491_v0 = vmax.f32 %v487_v63, %v454_v50  ;;  %v492_v4 = vmax.f32 %v488_v62, %v458_v53 }
 0x2c4   :  { %v501_v5 = vpack.c.bf16 %v492_v4, %v491_v0 }
 0x2c5   :  { %v1814_v6 = vpop.permute.xlu1 %1813 }
 0x2c6   :  { %v1816_v7 = vunpack.i.h.bf16 %v1814_v6  ;;  %v1815_v8 = vunpack.i.l.bf16 %v1814_v6  ;;  %1720 = vmatpush3.bf16.msra.mxu1 %v501_v5 }
 0x2c7   :  { %1721 = vmatprep.subr.bf16.mxu1 %v1975_v48 }
 0x2c8   :  { %v490_v9 = vmax.f32 %v466_v56, %v1816_v7  ;;  %v489_v10 = vmax.f32 %v462_v54, %v1815_v8 }
 0x2ca   :  { %v493_v11 = vmax.f32 %v489_v10, %v464_v55  ;;  %v494_v12 = vmax.f32 %v490_v9, %v468_v58  ;;  %v1875_v10 = vld [vmem:[#allocation2 + $0x200] ss:$8 sps:$4 sm:$0xff]  }
 0x2cc   :  { %v502_v13 = vpack.c.bf16 %v494_v12, %v493_v11  ;;  %v1876_v11 = vld [vmem:[#allocation2 + $0x210] ss:$8 sps:$4 sm:$0xff]   ;;  %v1877_v12 = vld [vmem:[#allocation2 + $0x220] ss:$8 sps:$4 sm:$0xff]  }
 0x2ce   :  { %1722 = vmatpush3.bf16.msra.mxu1 %v502_v13  ;;  %v1878_v13 = vld [vmem:[#allocation2 + $0x230] ss:$8 sps:$4 sm:$0xff]  }
 0x2cf   :  { %925 = vmatprep.subr.bf16.mxu1 %v1972_v1 }
 0x2d1   :  { %1724 = vmatmul.mubr.msk.bf16.vlgmr.msra.gmra.mrb[8].mxu1 %vm518_vm10, %v1860_v14  ;;  %v1879_v14 = vld [vmem:[#allocation2 + $0x240] ss:$8 sps:$4 sm:$0xff]  }
 0x2d2   :  { %1727 = vmatprep.mubr.msk.bf16.mxu1 %vm1977_vm9, %v1975_v48  ;;  %926 = vmatpush1.bf16.msra.mxu1 %v1875_v10  ;;  %v1893_v10 = vld [vmem:[#allocation2 + $0x2e0] ss:$8 sps:$4 sm:$0xff]  }
 0x2d3   :  { %927 = vmatprep.subr.bf16.mxu1 %v1972_v1 }
 0x2d6   :  { %928 = vmatpush1.bf16.msra.mxu1 %v1876_v11  ;;  %v1896_v11 = vld [vmem:[#allocation2 + $0x310] ss:$8 sps:$4 sm:$0xff]  }
 0x2d7   :  { %929 = vmatprep.subr.bf16.mxu1 %v1972_v1 }
 0x2d9   :  { %1728 = vmatmul.mubr.msk.bf16.gmra.mrb[12].mxu1 %vm518_vm10, %v1861_v15  ;;  %v1880_v15 = vld [vmem:[#allocation2 + $0x250] ss:$8 sps:$4 sm:$0xff]  }
 0x2da   :  { %1731 = vmatprep.mubr.msk.bf16.mxu1 %vm1977_vm9, %v1975_v48  ;;  %930 = vmatpush1.bf16.msra.mxu1 %v1877_v12  ;;  %v1897_v12 = vld [vmem:[#allocation2 + $0x320] ss:$8 sps:$4 sm:$0xff]  }
 0x2db   :  { %931 = vmatprep.subr.bf16.mxu1 %v1972_v1 }
 0x2de   :  { %932 = vmatpush1.bf16.msra.mxu1 %v1878_v13  ;;  %v1898_v13 = vld [vmem:[#allocation2 + $0x330] ss:$8 sps:$4 sm:$0xff]  }
 0x2df   :  { %933 = vmatprep.subr.bf16.mxu1 %v1972_v1 }
 0x2e1   :  { %1732 = vmatmul.mubr.msk.bf16.gmra.mrb[16].mxu1 %vm518_vm10, %v1862_v16  ;;  %v1881_v16 = vld [vmem:[#allocation2 + $0x260] ss:$8 sps:$4 sm:$0xff]  }
 0x2e2   :  { %934 = vmatpush1.bf16.msra.mxu1 %v1879_v14  ;;  %v1899_v14 = vld [vmem:[#allocation2 + $0x340] ss:$8 sps:$4 sm:$0xff]  }
 0x2e3   :  { %935 = vmatprep.subr.bf16.mxu1 %v1972_v1 }
 0x2e6   :  { %936 = vmatpush1.bf16.msra.mxu1 %v1880_v15  ;;  %v1900_v15 = vld [vmem:[#allocation2 + $0x350] ss:$8 sps:$4 sm:$0xff]  }
 0x2e7   :  { %937 = vmatprep.subr.bf16.mxu1 %v1972_v1 }
 0x2ea   :  { %938 = vmatpush1.bf16.msra.mxu1 %v1881_v16  ;;  %v1901_v16 = vld [vmem:[#allocation2 + $0x360] ss:$8 sps:$4 sm:$0xff]  }
 0x2eb   :  { %939 = vmatprep.subr.bf16.mxu1 %v1972_v1 }
 0x2ee   :  { %940 = vmatpush1.bf16.msra.mxu1 %v1882_v17  ;;  %v1902_v17 = vld [vmem:[#allocation2 + $0x370] ss:$8 sps:$4 sm:$0xff]  }
 0x2ef   :  { %941 = vmatprep.subr.bf16.mxu1 %v1972_v1 }
 0x2f2   :  { %942 = vmatpush1.bf16.msra.mxu1 %v1883_v18  ;;  %v1903_v18 = vld [vmem:[#allocation2 + $0x380] ss:$8 sps:$4 sm:$0xff]  }
 0x2f3   :  { %943 = vmatprep.subr.bf16.mxu1 %v1972_v1 }
 0x2f6   :  { %944 = vmatpush1.bf16.msra.mxu1 %v1884_v19  ;;  %v1904_v19 = vld [vmem:[#allocation2 + $0x390] ss:$8 sps:$4 sm:$0xff]  }
 0x2f7   :  { %945 = vmatprep.subr.bf16.mxu1 %v1972_v1 }
 0x2fa   :  { %946 = vmatpush1.bf16.msra.mxu1 %v1885_v20 }
 0x2fb   :  { %947 = vmatprep.subr.bf16.mxu1 %v1972_v1 }
 0x2fe   :  { %948 = vmatpush1.bf16.msra.mxu1 %v1886_v21 }
 0x2ff   :  { %1741 = vmatprep.subr.bf16.mxu1 %v1975_v48 }
 0x3a4   :  { %v562_v28 = vpop.f32.mrb[8].mxu1 }
 0x3a5   :  { %v1725_v29 = vpop.f32.mrb[9].mxu1 }
 0x3a6   :  { %v565_v30 = vpop.f32.mrb[10].mxu1 }
 0x3a7   :  { %v1726_v31 = vpop.f32.mrb[11].mxu1 }
 0x3ac   :  { %v570_v32 = vpop.f32.mrb[12].mxu1 }
 0x3ad   :  { %v585_v33 = vmax.f32 %v562_v28, %v570_v32  ;;  %v1729_v34 = vpop.f32.mrb[13].mxu1 }
 0x3ae   :  { %v573_v35 = vpop.f32.mrb[14].mxu1 }
 0x3af   :  { %v586_v37 = vmax.f32 %v565_v30, %v573_v35  ;;  %v1730_v38 = vpop.f32.mrb[15].mxu1 }
 0x3b4   :  { %v578_v39 = vpop.f32.mrb[16].mxu1 }
 0x3b5   :  { %v2125_v42 = vmax.f32 %v585_v33, %v578_v39  ;;  %v1733_v43 = vpop.f32.mrb[17].mxu1 }
 0x3b6   :  { %v581_v44 = vpop.f32.mrb[18].mxu1 }
 0x3b7   :  { %v2127_v45 = vmax.f32 %v586_v37, %v581_v44  ;;  %v1734_v46 = vpop.f32.mrb[19].mxu1  ;;  %v627_v49 = vrot.slane %v2125_v42, 1  ;;  %v615_v58 = vrot.slane %v2125_v42, 7 }
 0x3b9   :  { %v628_v50 = vrot.slane %v2127_v45, 1  ;;  %v1817_v51 = vpack.i.bf16 %v2127_v45, %v2125_v42  ;;  %v616_v57 = vrot.slane %v2127_v45, 7 }
 0x3bb   :  { %1818 = vrot.lane.b32.xlu0 %v1817_v51, %s1976_s9  ;;  %v629_v52 = vsel %vm120_vm0, %v627_v49, %v628_v50  ;;  %v630_v53 = vsel %vm120_vm0, %v628_v50, %v627_v49  ;;  %v617_v61 = vsel %vm95_vm1, %v615_v58, %v616_v57  ;;  %v618_v62 = vsel %vm95_vm1, %v616_v57, %v615_v58  ;;  %v1640_v57 = vld [vmem:[%s2286_s2 + $0x10] ss:$0 sm:$0xff] }
 0x3bc   :  { %v635_v54 = vsel %vm2129_vm11, %v629_v52, 0.0  ;;  %v636_v55 = vsel %vm2137_vm12, %v630_v53, 0.0  ;;  %v623_v5 = vsel %vm2153_vm14, %v618_v62, 0.0  ;;  %v624_v6 = vsel %vm2157_vm15, %v617_v61, 0.0 }
 0x3bd   :  { %v649_v56 = vpack.c.bf16 %v636_v55, %v635_v54  ;;  %v1889_v54 = vld [vmem:[#allocation2 + $0x3a0] ss:$8 sps:$4 sm:$0xff]   ;;  %v1890_v55 = vld [vmem:[#allocation2 + $0x3b0] ss:$8 sps:$4 sm:$0xff]  }
 0x3bf   :  { %1639 = vmatprep.mubr.msk.bf16.mxu0 %vm645_vm13, %v649_v56  ;;  %v1891_v56 = vld [vmem:[#allocation2 + $0x3c0] ss:$8 sps:$4 sm:$0xff]  }
 0x42d   :  { %v1819_v63 = vpop.permute.xlu0 %1818 }
 0x42e   :  { %v1821_v0 = vunpack.i.h.bf16 %v1819_v63  ;;  %v1820_v4 = vunpack.i.l.bf16 %v1819_v63 }
 0x430   :  { %v646_v7 = vsel %vm645_vm13, %v623_v5, %v1820_v4  ;;  %v647_v8 = vsel %vm645_vm13, %v624_v6, %v1821_v0 }
 0x431   :  { %v648_v9 = vpack.c.bf16 %v647_v8, %v646_v7  ;;  %v1888_v8 = vld [vmem:[#allocation2 + $0x2d0] ss:$0 sps:$4 sm:$0xff]  }
 0x433   :  { %787 = vmatmul.mubr.bf16.vlgmr.msra.gmra.mrb[8].mxu0 %v648_v9  ;;  %v1892_v9 = vld [vmem:[#allocation2 + $0x3d0] ss:$8 sps:$4 sm:$0xff]  }
 0x434   :  { %1737 = vmatprep.mubr.msk.bf16.mxu0 %vm260_vm7, %v1887_v3 }
 0x506   :  { %v788_v24 = vpop.f32.mrb[8].mxu0 }
 0x507   :  { %v789_v25 = vadd.f32 %v1626_v23, %v788_v24  ;;  %v790_v22 = vpop.f32.mrb[9].mxu0 }
 0x508   :  { %v791_v26 = vpop.f32.mrb[10].mxu0 }
 0x509   :  { %v795_v27 = vmax.f32 %v789_v25, 0.0  ;;  %v792_v28 = vadd.f32 %v1626_v23, %v791_v26  ;;  %v793_v29 = vpop.f32.mrb[11].mxu0 }
 0x50a   :  { %v1905_v29 = vld [vmem:[#allocation2 + $0x3e0] ss:$8 sps:$4 sm:$0xff]  }
 0x50b   :  { %v796_v30 = vmax.f32 %v792_v28, 0.0  ;;  %v797_v31 = vrot.slane %v795_v27, 7  ;;  %v803_v32 = vrot.slane %v795_v27, 1 }
 0x50d   :  { %v798_v33 = vrot.slane %v796_v30, 7  ;;  %v804_v34 = vrot.slane %v796_v30, 1  ;;  %v1822_v35 = vpack.i.bf16 %v796_v30, %v795_v27  ;;  %v1906_v30 = vld [vmem:[#allocation2 + $0x3f0] ss:$8 sps:$4 sm:$0xff]  }
 0x50f   :  { %1823 = vrot.lane.b32.xlu1 %v1822_v35, %s1976_s9  ;;  %v805_v36 = vsel %vm120_vm0, %v803_v32, %v804_v34  ;;  %v806_v37 = vsel %vm120_vm0, %v804_v34, %v803_v32  ;;  %v799_v38 = vsel %vm95_vm1, %v797_v31, %v798_v33  ;;  %v800_v39 = vsel %vm95_vm1, %v798_v33, %v797_v31  ;;  %v1907_v31 = vld [vmem:[#allocation2 + $0x400] ss:$8 sps:$4 sm:$0xff]   ;;  %v1908_v32 = vld [vmem:[#allocation2 + $0x410] ss:$8 sps:$4 sm:$0xff]  }
 0x510   :  { %v807_v40 = vsel %vm2129_vm11, %v805_v36, 0.0  ;;  %v808_v41 = vsel %vm2137_vm12, %v806_v37, 0.0  ;;  %v801_v50 = vsel %vm2153_vm14, %v800_v39, 0.0  ;;  %v802_v51 = vsel %vm2157_vm15, %v799_v38, 0.0  ;;  %v1909_v33 = vld [vmem:[#allocation2 + $0x420] ss:$8 sps:$4 sm:$0xff]  }
 0x511   :  { %v820_v43 = vpack.c.bf16 %v808_v41, %v807_v40  ;;  %v1910_v34 = vld [vmem:[#allocation2 + $0x430] ss:$8 sps:$4 sm:$0xff]   ;;  %v1911_v35 = vld [vmem:[#allocation2 + $0x440] ss:$8 sps:$4 sm:$0xff]  }
 0x512   :  { %v1912_v36 = vld [vmem:[#allocation2 + $0x450] ss:$8 sps:$4 sm:$0xff]   ;;  %v1913_v37 = vld [vmem:[#allocation2 + $0x460] ss:$8 sps:$4 sm:$0xff]  }
 0x513   :  { %1653 = vmatprep.mubr.msk.bf16.mxu1 %vm645_vm13, %v820_v43  ;;  %v1914_v38 = vld [vmem:[#allocation2 + $0x470] ss:$8 sps:$4 sm:$0xff]   ;;  %v1915_v39 = vld [vmem:[#allocation2 + $0x480] ss:$8 sps:$4 sm:$0xff]  }
 0x514   :  { %v1916_v40 = vld [vmem:[#allocation2 + $0x490] ss:$8 sps:$4 sm:$0xff]  }
 0x515   :  { %v1658_v41 = vld [vmem:[%s2286_s2 + $0x18] ss:$0 sm:$0xff] }
 0x581   :  { %v1824_v44 = vpop.permute.xlu1 %1823 }
 0x582   :  { %v1826_v46 = vunpack.i.h.bf16 %v1824_v44  ;;  %v1825_v49 = vunpack.i.l.bf16 %v1824_v44  ;;  %v1273_v44 = vand.u32 3, %v2013_v2 }
 0x584   :  { %v817_v52 = vsel %vm645_vm13, %v801_v50, %v1825_v49  ;;  %v818_v47 = vsel %vm645_vm13, %v802_v51, %v1826_v46  ;;  %vm1286_vm0 = vcmp.ne.s32.totalorder %v1273_v44, 3  ;;  %vm1281_vm1 = vcmp.ne.s32.totalorder %v1273_v44, 0 }
 0x585   :  { %v819_v53 = vpack.c.bf16 %v818_v47, %v817_v52 }
 0x587   :  { %958 = vmatmul.mubr.bf16.vlgmr.msra.gmra.mrb[20].mxu1 %v819_v53 }
 0x588   :  { %1749 = vmatprep.mubr.msk.bf16.mxu1 %vm1977_vm9, %v1975_v48  ;;  %1742 = vmatpush3.bf16.msra.mxu1 %v1889_v54 }
 0x589   :  { %1743 = vmatprep.subr.bf16.mxu1 %v1975_v48 }
 0x58c   :  { %1744 = vmatpush3.bf16.msra.mxu1 %v1890_v55 }
 0x58d   :  { %1745 = vmatprep.subr.bf16.mxu1 %v1975_v48 }
 0x590   :  { %1746 = vmatpush3.bf16.msra.mxu1 %v1891_v56 }
 0x591   :  { %1747 = vmatprep.subr.bf16.mxu1 %v1975_v48 }
 0x594   :  { %1748 = vmatpush3.bf16.msra.mxu1 %v1892_v9  ;;  %v1918_v9 = vld [vmem:[#allocation2 + $0x4c0] ss:$8 sps:$4 sm:$0xff]  }
 0x595   :  { %1402 = vmatprep.subr.bf16.mxu1 %v1972_v1 }
 0x65a   :  { %v959_v58 = vpop.f32.mrb[20].mxu1 }
 0x65b   :  { %v960_v59 = vadd.f32 %v1640_v57, %v959_v58  ;;  %v961_v60 = vpop.f32.mrb[21].mxu1  ;;  %v1678_v58 = vld [vmem:[%s2286_s2 + $0x28] ss:$0 sm:$0xff] }
 0x65c   :  { %v962_v61 = vpop.f32.mrb[22].mxu1 }
 0x65d   :  { %v966_v62 = vadd.f32 %v960_v59, %v2125_v42  ;;  %v963_v63 = vadd.f32 %v1640_v57, %v962_v61  ;;  %v964_v0 = vpop.f32.mrb[23].mxu1  ;;  %v1894_v42 = vld [vmem:[#allocation2 + $0x2f0] ss:$8 sps:$4 sm:$0xff]   ;;  %v1672_v57 = vld [vmem:[%s2286_s2 + $0x20] ss:$0 sm:$0xff] }
 0x65e   :  { %v1771_v59 = vadd.f32 %v1678_v58, %v1672_v57 }
 0x65f   :  { %v967_v4 = vadd.f32 %v963_v63, %v2127_v45  ;;  %v968_v5 = vmax.f32 %v966_v62, 0.0  ;;  %v1895_v45 = vld [vmem:[#allocation2 + $0x300] ss:$8 sps:$4 sm:$0xff]  }
 0x661   :  { %v969_v6 = vmax.f32 %v967_v4, 0.0 }
 0x663   :  { %v973_v7 = vpack.c.bf16 %v969_v6, %v968_v5 }
 0x665   :  { %1735 = vmatprep.subr.bf16.mxu0 %v973_v7 }
 0x666   :  { %1736 = vmatpush3.bf16.msra.mxu0 %v973_v7  ;;  %v1444_v7 = vld [vmem:[#allocation2 + $0x4a0] sm:$0x1] }
 0x667   :  { %1147 = vmatprep.subr.bf16.mxu0 %v1972_v1 }
 0x669   :  { %1738 = vmatmul.mubr.msk.bf16.vlgmr.msra.gmra.mrb[12].mxu0 %vm260_vm7, %v1888_v8  ;;  %v1917_v8 = vld [vmem:[#allocation2 + $0x4b0] ss:$8 sps:$4 sm:$0xff]  }
 0x66a   :  { %1148 = vmatpush1.bf16.msra.mxu0 %v1893_v10  ;;  %v1919_v10 = vld [vmem:[#allocation2 + $0x4d0] ss:$8 sps:$4 sm:$0xff]  }
 0x66b   :  { %1149 = vmatprep.subr.bf16.mxu0 %v1972_v1 }
 0x66e   :  { %1150 = vmatpush1.bf16.msra.mxu0 %v1894_v42  ;;  %v1920_v42 = vld [vmem:[#allocation2 + $0x4e0] ss:$8 sps:$4 sm:$0xff]  }
 0x66f   :  { %1151 = vmatprep.subr.bf16.mxu0 %v1972_v1 }
 0x672   :  { %1152 = vmatpush1.bf16.msra.mxu0 %v1895_v45 }
 0x673   :  { %1153 = vmatprep.subr.bf16.mxu0 %v1972_v1 }
 0x676   :  { %1154 = vmatpush1.bf16.msra.mxu0 %v1896_v11 }
 0x677   :  { %1155 = vmatprep.subr.bf16.mxu0 %v1972_v1 }
 0x67a   :  { %1156 = vmatpush1.bf16.msra.mxu0 %v1897_v12 }
 0x67b   :  { %1157 = vmatprep.subr.bf16.mxu0 %v1972_v1 }
 0x67e   :  { %1158 = vmatpush1.bf16.msra.mxu0 %v1898_v13 }
 0x67f   :  { %1159 = vmatprep.subr.bf16.mxu0 %v1972_v1 }
 0x682   :  { %1160 = vmatpush1.bf16.msra.mxu0 %v1899_v14 }
 0x683   :  { %1161 = vmatprep.subr.bf16.mxu0 %v1972_v1 }
 0x686   :  { %1162 = vmatpush1.bf16.msra.mxu0 %v1900_v15  ;;  %v1693_v15 = vld [vmem:[%s2286_s2 + $0x30] ss:$0 sm:$0xff] }
 0x687   :  { %1163 = vmatprep.subr.bf16.mxu0 %v1972_v1 }
 0x68a   :  { %1164 = vmatpush1.bf16.msra.mxu0 %v1901_v16 }
 0x68b   :  { %1165 = vmatprep.subr.bf16.mxu0 %v1972_v1 }
 0x68e   :  { %1166 = vmatpush1.bf16.msra.mxu0 %v1902_v17 }
 0x68f   :  { %1167 = vmatprep.subr.bf16.mxu0 %v1972_v1 }
 0x692   :  { %1168 = vmatpush1.bf16.msra.mxu0 %v1903_v18 }
 0x693   :  { %1169 = vmatprep.subr.bf16.mxu0 %v1972_v1 }
 0x696   :  { %1170 = vmatpush1.bf16.msra.mxu0 %v1904_v19 }
 0x697   :  { %1753 = vmatprep.subr.bf16.mxu0 %v1975_v48 }
 0x73c   :  { %v1739_v20 = vpop.f32.mrb[12].mxu0 }
 0x73d   :  { %v1042_v21 = vpack.c.bf16 %v1739_v20, %v1739_v20  ;;  %v1022_v23 = vpop.f32.mrb[13].mxu0 }
 0x73e   :  { %v1740_v24 = vpop.f32.mrb[14].mxu0 }
 0x73f   :  { %v1025_v25 = vpop.f32.mrb[15].mxu0  ;;  %1671 = vmatprep.mubr.msk.bf16.mxu0 %vm645_vm13, %v1042_v21 }
 0x740   :  { %v1188_v22 = vpack.c.bf16 %v1025_v25, %v1025_v25  ;;  %1037 = vrot.lane.b32.xlu0 %v1025_v25, %s1976_s9 }
 0x742   :  { %1750 = vmatmul.mubr.msk.bf16.vlgmr.msra.gmra.mrb[24].mxu1 %vm645_vm13, %v1188_v22 }
 0x743   :  { %1403 = vmatpush1.bf16.msra.mxu1 %v1905_v29 }
 0x744   :  { %1404 = vmatprep.subr.bf16.mxu1 %v1972_v1 }
 0x747   :  { %1405 = vmatpush1.bf16.msra.mxu1 %v1906_v30 }
 0x748   :  { %1406 = vmatprep.subr.bf16.mxu1 %v1972_v1 }
 0x74b   :  { %1407 = vmatpush1.bf16.msra.mxu1 %v1907_v31 }
 0x74c   :  { %1408 = vmatprep.subr.bf16.mxu1 %v1972_v1 }
 0x74f   :  { %1409 = vmatpush1.bf16.msra.mxu1 %v1908_v32 }
 0x750   :  { %1410 = vmatprep.subr.bf16.mxu1 %v1972_v1 }
 0x753   :  { %1411 = vmatpush1.bf16.msra.mxu1 %v1909_v33 }
 0x754   :  { %1412 = vmatprep.subr.bf16.mxu1 %v1972_v1 }
 0x757   :  { %1413 = vmatpush1.bf16.msra.mxu1 %v1910_v34 }
 0x758   :  { %1414 = vmatprep.subr.bf16.mxu1 %v1972_v1 }
 0x75b   :  { %1415 = vmatpush1.bf16.msra.mxu1 %v1911_v35 }
 0x75c   :  { %1416 = vmatprep.subr.bf16.mxu1 %v1972_v1 }
 0x75f   :  { %1417 = vmatpush1.bf16.msra.mxu1 %v1912_v36 }
 0x760   :  { %1418 = vmatprep.subr.bf16.mxu1 %v1972_v1 }
 0x763   :  { %1419 = vmatpush1.bf16.msra.mxu1 %v1913_v37 }
 0x764   :  { %1420 = vmatprep.subr.bf16.mxu1 %v1972_v1 }
 0x767   :  { %1421 = vmatpush1.bf16.msra.mxu1 %v1914_v38 }
 0x768   :  { %1422 = vmatprep.subr.bf16.mxu1 %v1972_v1 }
 0x76b   :  { %1423 = vmatpush1.bf16.msra.mxu1 %v1915_v39 }
 0x76c   :  { %1424 = vmatprep.subr.bf16.mxu1 %v1972_v1 }
 0x76f   :  { %1425 = vmatpush1.bf16.msra.mxu1 %v1916_v40 }
 0x7b2   :  { %v1038_v26 = vpop.permute.xlu0 %1037 }
 0x7b3   :  { %v1040_v27 = vsel %vm645_vm13, %v1022_v23, %v1038_v26 }
 0x7b4   :  { %v1041_v28 = vpack.c.bf16 %v1040_v27, %v1040_v27 }
 0x7b6   :  { %1180 = vmatmul.mubr.bf16.vlgmr.msra.gmra.mrb[16].mxu0 %v1041_v28 }
 0x7b7   :  { %1755 = vmatprep.mubr.msk.bf16.mxu0 %vm1977_vm9, %v1975_v48 }
 0x889   :  { %v1181_v43 = vpop.f32.mrb[16].mxu0 }
 0x88a   :  { %v1182_v46 = vadd.f32 %v1658_v41, %v1181_v43  ;;  %v1183_v49 = vpop.f32.mrb[17].mxu0 }
 0x88b   :  { %v1184_v50 = vpop.f32.mrb[18].mxu0 }
 0x88c   :  { %v1187_v51 = vmax.f32 %v1182_v46, 0.0  ;;  %v1185_v52 = vpop.f32.mrb[19].mxu0 }
 0x88e   :  { %v1282_v47 = vrot.slane %v1187_v51, 7  ;;  %v1287_v53 = vrot.slane %v1187_v51, 1  ;;  %1292 = vrot.lane.b32.xlu1 %v1187_v51, %s1976_s9 }
 0x890   :  { %v1290_v1 = vsel %vm1286_vm0, %v1287_v53, 0.0  ;;  %v1285_v3 = vsel %vm1281_vm1, %v1282_v47, 0.0 }
 0x891   :  { %v1297_v54 = vpack.c.bf16 %v1290_v1, %v1290_v1 }
 0x893   :  { %1691 = vmatprep.mubr.msk.bf16.mxu1 %vm645_vm13, %v1297_v54 }
 0x900   :  { %v1293_v55 = vpop.permute.xlu1 %1292 }
 0x901   :  { %v1295_v56 = vsel %vm645_vm13, %v1285_v3, %v1293_v55 }
 0x902   :  { %v1296_v2 = vpack.c.bf16 %v1295_v56, %v1295_v56 }
 0x904   :  { %1435 = vmatmul.mubr.bf16.vlgmr.msra.gmra.mrb[24].mxu1 %v1296_v2 }
 0x9d7   :  { %v1436_v60 = vpop.f32.mrb[24].mxu1 }
 0x9d8   :  { %v1772_v61 = vadd.f32 %v1771_v59, %v1436_v60  ;;  %v1438_v62 = vpop.f32.mrb[25].mxu1 }
 0x9d9   :  { %v1439_v63 = vpop.f32.mrb[26].mxu1 }
 0x9da   :  { %v1443_v0 = vmax.f32 %v1772_v61, 0.0  ;;  %v1440_v4 = vpop.f32.mrb[27].mxu1 }
 0x9dc   :  { %v1445_v5 = vpack.c.bf16 %v1443_v0, %v1443_v0 }
 0x9de   :  { %v1452_v6 = vsel %vm1450_vm2, %v1445_v5, 0 }
 0x9df   :  { %1754 = vmatpush3.bf16.msra.mxu0 %v1452_v6 }
 0x9e0   :  { %1759 = vmatprep.subr.bf16.mxu0 %v1975_v48 }
 0x9e2   :  { %1756 = vmatmul.mubr.msk.bf16.vlgmr.msra.gmra.mrb[20].mxu0 %vm1446_vm3, %v1444_v7 }
 0x9e3   :  { %1760 = vmatpush3.bf16.msra.mxu0 %v1917_v8  ;;  %1767 = vmatprep.mubr.msk.bf16.mxu0 %vm1977_vm9, %v1975_v48 }
 0x9e4   :  { %1761 = vmatprep.subr.bf16.mxu0 %v1975_v48 }
 0x9e7   :  { %1762 = vmatpush3.bf16.msra.mxu0 %v1918_v9 }
 0x9e8   :  { %1763 = vmatprep.subr.bf16.mxu0 %v1975_v48 }
 0x9eb   :  { %1764 = vmatpush3.bf16.msra.mxu0 %v1919_v10 }
 0x9ec   :  { %1765 = vmatprep.subr.bf16.mxu0 %v1975_v48 }
 0x9ef   :  { %1766 = vmatpush3.bf16.msra.mxu0 %v1920_v42 }
 0xab5   :  { %v1488_v45 = vpop.f32.mrb[20].mxu0 }
 0xab6   :  { %v1494_v11 = vpack.c.bf16 %v1488_v45, %v1488_v45  ;;  %v1757_v12 = vpop.f32.mrb[21].mxu0 }
 0xab7   :  { %v1491_v13 = vpop.f32.mrb[22].mxu0 }
 0xab8   :  { %v1758_v14 = vpop.f32.mrb[23].mxu0  ;;  %1768 = vmatmul.mubr.msk.bf16.vlgmr.msra.gmra.mrb[24].mxu0 %vm645_vm13, %v1494_v11 }
 0xb8b   :  { %v1569_v16 = vpop.f32.mrb[24].mxu0 }
 0xb8c   :  { %v1570_v17 = vadd.f32 %v1693_v15, %v1569_v16  ;;  %v1769_v18 = vpop.f32.mrb[25].mxu0 }
 0xb8d   :  { %v1572_v48 = vpop.f32.mrb[26].mxu0 }
 0xb8e   :  { %v1770_v19 = vpop.f32.mrb[27].mxu0  ;;  %1576 = vst.msk [vmem:[#allocation5] sm:$0x3] %vm1575_vm4, %v1570_v17 }
 0xb8f   :  { %1954 = shalt.err (!%p1951_p12)
}
 0xb90   :  { %s1955_s2 = scalar_lea.hbm %s2287_s3, 32 }
 0xb91   :  { %p1956_p13 = scmp.ne.s32.totalorder %s2287_s3, %s1955_s2  ;;  %p1959_p0 = scmp.lt.u32.totalorder %s1955_s2, %s2287_s3 }
 0xb93   :  { %p1961_p1 = pnand %p1959_p0, %p1956_p13 }
 0xb95   :  { %1964 = shalt.err (!%p1961_p1)
}
 0xb96   :  { %1586 = dma.vmem_to_hbm [thread:$0]  %s1584_s23, 32, %s2287_s3, [#allocation4]  }
 0xb97   :  { %1967 = dma.done.wait [#allocation4], 32  }
 0xb98   :  { %1968 = vsyncadd [#allocation4], 4294967264 }
 0xb99   :  { %1590 = vsyncpa [#allocation3], 1 }
 0xb9a   :  { %1591 = vsyncpa [#allocation4], 1 }

</bundles_post_ra>
